<compile_context>
chip_gen: v7x
topology: tpu7x:2x2x1
jax: 0.10.0
libtpu: 0.0.40
codegen_flags: <defaults>
</compile_context>

<pallas_src>
import math
import jax
import jax.numpy as jnp
import numpy as np
from jax.experimental import pallas as pl
from jax.experimental.pallas import tpu as pltpu  # noqa: F401  (TPU backend)

# ----------------------------------------------------------------------------
# Hyper-parameters (embed_dim < 2048 -> 2-Linear projection branch;
# proj_dim + 4 divisible by num_heads as PyTorch MHA requires).
# ----------------------------------------------------------------------------
EMBED_DIM = 32
MID_DIM2  = 16
PROJ_DIM  = 28
NUM_HEADS = 4
D_MODEL   = PROJ_DIM + 4            # 32
HEAD_DIM  = D_MODEL // NUM_HEADS    # 8
FF_DIM    = PROJ_DIM                # dim_feedforward = proj_dim
SEQ_LEN   = 8
BATCH     = 2
N_SAMP    = 2 * BATCH               # x1 and x2 stacked -> 4 samples
M_ROWS    = N_SAMP * SEQ_LEN        # 32 stacked token rows
HM        = NUM_HEADS * M_ROWS      # 128 (heads x keys)
FEAT_DIM  = EMBED_DIM + 4           # raw input feature width (36)
LN_EPS    = 1e-5
LRELU_SLOPE = 0.01

SLAB_W = 128                        # lane width of the packed slabs

# weight-slab row offsets (all multiples of 8)
W_PW1, W_PW2, W_QKV, W_WO, W_WF1, W_WF2 = 0, 32, 48, 80, 112, 144
WSLAB_ROWS = 176

# aux-slab row offsets
R_PB1, R_PG1, R_PBT1 = 0, 1, 2
R_PB2, R_PG2, R_PBT2 = 3, 4, 5
R_BQKV, R_BO         = 6, 7
R_LN1G, R_LN1B       = 8, 9
R_BF1, R_BF2         = 10, 11
R_LN2G, R_LN2B       = 12, 13
R_TW, R_TB           = 14, 15       # transform2 weight / bias (lane 0)
R_HMASK              = 16           # 4 rows, (H, D_MODEL) head lane masks
R_SEL1, R_SEL2       = 20, 22       # 2 rows each, (B, N) row selectors
R_SEG                = 24           # 4 rows, (N, M) per-sample sum matrix
R_BLK                = 32           # 128 rows, (HM, HM) block-ones matrix
AUX_ROWS             = R_BLK + HM   # 160

# per-call activation slab row offsets
A_FEAT, A_ADD, A_SEGM = 0, 32, 64
ACT_ROWS = 72

OUT_ROWS, OUT_W = 8, 128


# ----------------------------------------------------------------------------
# In-kernel helpers.
# ----------------------------------------------------------------------------
def _layernorm(x, g, b, inv_n):
    # Single-pass statistics: sum(x) and sum(x*x) are independent reductions.
    mu = jnp.sum(x, axis=-1, keepdims=True) * inv_n
    ex2 = jnp.sum(x * x, axis=-1, keepdims=True) * inv_n
    var = jnp.maximum(ex2 - mu * mu, 0.0)
    return (x - mu) * jax.lax.rsqrt(var + LN_EPS) * g + b


def _leaky_relu(x):
    return jnp.where(x >= 0, x, LRELU_SLOPE * x)


# ----------------------------------------------------------------------------
# The Pallas kernel: whole forward on the fully stacked activation (M, D).
# ----------------------------------------------------------------------------
def abmap_kernel(acts_ref, bias_ref, wslab_ref, aux_ref, out_ref):

    def arow(r, w):                       # (1, w) row of the aux slab
        return aux_ref[r:r + 1, :w]

    feat = acts_ref[A_FEAT:A_FEAT + M_ROWS, :]          # (32, 32)
    add  = acts_ref[A_ADD:A_ADD + M_ROWS, :]            # (32, 32)
    seg_mean = acts_ref[A_SEGM:A_SEGM + N_SAMP, :]      # (4, 32)

    # ---- self.project : Linear -> LN -> LeakyReLU -> Linear -> LN ->
    #      LeakyReLU -> Dropout(identity in eval)
    h = jnp.dot(feat, wslab_ref[W_PW1:W_PW1 + EMBED_DIM, :MID_DIM2],
                preferred_element_type=jnp.float32) + arow(R_PB1, MID_DIM2)
    h = _leaky_relu(_layernorm(h, arow(R_PG1, MID_DIM2), arow(R_PBT1, MID_DIM2),
                               1.0 / MID_DIM2))
    h = jnp.dot(h, wslab_ref[W_PW2:W_PW2 + MID_DIM2, :D_MODEL],
                preferred_element_type=jnp.float32) + arow(R_PB2, D_MODEL)
    # lanes 28..31 are exactly 0 (zero-padded weight cols / bias / gamma / beta),
    # so plain LN with 1/PROJ_DIM statistics reproduces LayerNorm(28) exactly.
    h = _leaky_relu(_layernorm(h, arow(R_PG2, D_MODEL), arow(R_PBT2, D_MODEL),
                               1.0 / PROJ_DIM))

    # positional encoding (lanes 0..27) + raw position features (lanes 28..31)
    s = h + add                                          # (M, D_MODEL)

    # ---- fused QKV projection ----
    qkv = jnp.dot(s, wslab_ref[W_QKV:W_QKV + D_MODEL, :3 * D_MODEL],
                  preferred_element_type=jnp.float32) + arow(R_BQKV, 3 * D_MODEL)
    q = qkv[:, :D_MODEL]
    k = qkv[:, D_MODEL:2 * D_MODEL]
    v = qkv[:, 2 * D_MODEL:3 * D_MODEL]

    # ---- fused multi-head attention (single lane-dense pass over all heads):
    #   K_all/V_all = row-stack_h(K*hm_h) -> (HM, D);  S_all = Q @ K_all^T
    k_all = jnp.concatenate(
        [k * aux_ref[R_HMASK + hh:R_HMASK + hh + 1, :D_MODEL]
         for hh in range(NUM_HEADS)], axis=0)            # (128, 32)
    v_all = jnp.concatenate(
        [v * aux_ref[R_HMASK + hh:R_HMASK + hh + 1, :D_MODEL]
         for hh in range(NUM_HEADS)], axis=0)            # (128, 32)

    scale = 1.0 / math.sqrt(HEAD_DIM)
    s_all = jax.lax.dot_general(q, k_all, (((1,), (1,)), ((), ())),
                                preferred_element_type=jnp.float32)   # (32,128)
    s_all = s_all * scale + bias_ref[...]
    # One row-global max: the same constant per row leaves every per-head
    # softmax segment invariant.
    s_all = s_all - jnp.max(s_all, axis=-1, keepdims=True)
    e = jnp.exp(s_all)
    # Per-head denominators broadcast back across the head segment via one
    # matmul against the precomputed block-diagonal ones matrix.
    denom = jnp.dot(e, aux_ref[R_BLK:R_BLK + HM, :HM],
                    preferred_element_type=jnp.float32)               # (32,128)
    p = e * pl.reciprocal(denom, approx=True)
    att = jnp.dot(p, v_all, preferred_element_type=jnp.float32)       # (32, 32)

    att = jnp.dot(att, wslab_ref[W_WO:W_WO + D_MODEL, :D_MODEL],
                  preferred_element_type=jnp.float32) + arow(R_BO, D_MODEL)
    s1 = _layernorm(s + att, arow(R_LN1G, D_MODEL), arow(R_LN1B, D_MODEL),
                    1.0 / D_MODEL)
    ff = jnp.maximum(
        jnp.dot(s1, wslab_ref[W_WF1:W_WF1 + D_MODEL, :FF_DIM],
                preferred_element_type=jnp.float32) + arow(R_BF1, FF_DIM), 0.0)
    ff = jnp.dot(ff, wslab_ref[W_WF2:W_WF2 + FF_DIM, :D_MODEL],
                 preferred_element_type=jnp.float32) + arow(R_BF2, D_MODEL)
    s2 = _layernorm(s1 + ff, arow(R_LN2G, D_MODEL), arow(R_LN2B, D_MODEL),
                    1.0 / D_MODEL)

    # ---- per-sample reductions as matmuls against precomputed segment matrices
    # (module sums over ALL positions, divides by #valid; log(sum(exp)) over all)
    seg = aux_ref[R_SEG:R_SEG + N_SAMP, :M_ROWS]                       # (4, 32)
    mean_v = jnp.dot(seg_mean, s2, preferred_element_type=jnp.float32)
    lse_v = jnp.log(jnp.dot(seg, jnp.exp(s2),
                            preferred_element_type=jnp.float32))
    # TODO(synk): module uses the unstabilised log(sum(exp(.))); matched exactly.

    def l2n(u):                                   # F.normalize, eps = 1e-12
        nrm = jnp.sqrt(jnp.sum(u * u, axis=-1, keepdims=True))
        return u * pl.reciprocal(jnp.maximum(nrm, 1e-12), approx=True)

    z = jnp.concatenate([l2n(mean_v), l2n(lse_v)], axis=-1)            # (4, 64)

    # ---- cosine similarity + transform2 (Linear(1,1)) folded into the kernel
    z1 = jnp.dot(aux_ref[R_SEL1:R_SEL1 + BATCH, :N_SAMP], z,
                 preferred_element_type=jnp.float32)                   # (2, 64)
    z2 = jnp.dot(aux_ref[R_SEL2:R_SEL2 + BATCH, :N_SAMP], z,
                 preferred_element_type=jnp.float32)                   # (2, 64)
    dp = jnp.sum(z1 * z2, axis=-1, keepdims=True)
    n1 = jnp.sqrt(jnp.sum(z1 * z1, axis=-1, keepdims=True))
    n2 = jnp.sqrt(jnp.sum(z2 * z2, axis=-1, keepdims=True))
    pred = dp / jnp.maximum(n1 * n2, 1e-8)
    pred = pred * aux_ref[R_TW:R_TW + 1, 0:1] + aux_ref[R_TB:R_TB + 1, 0:1]

    # ---- lane-dense (8, 128) output: rows 0..3 = z (lanes 0..63),
    #      rows 4..5 = pred (read lane 0 host-side), rows 6..7 = 0.
    out_ref[...] = jnp.zeros((OUT_ROWS, OUT_W), jnp.float32)
    out_ref[0:N_SAMP, :] = jnp.concatenate(
        [z, jnp.zeros((N_SAMP, OUT_W - 2 * D_MODEL), jnp.float32)], axis=-1)
    out_ref[N_SAMP:N_SAMP + BATCH, :] = jnp.broadcast_to(pred, (BATCH, OUT_W))


# ----------------------------------------------------------------------------
# One-time (model-load) parameter / constant packing.
# ----------------------------------------------------------------------------
def prepare_params(params, pe, transform_w, transform_b):
    f32 = jnp.float32
    P = {kk: jnp.asarray(vv, f32) for kk, vv in params.items()}

    # ---- weight slab: all matmul weights row-stacked, zero-padded to 128 lanes
    def put(slab, r, a):
        return slab.at[r:r + a.shape[0], :a.shape[1]].set(a)

    wslab = jnp.zeros((WSLAB_ROWS, SLAB_W), f32)
    wslab = put(wslab, W_PW1, P['pw1'])                                # (32,16)
    wslab = put(wslab, W_PW2, P['pw2'])                                # (16,28)
    wslab = put(wslab, W_QKV,
                jnp.concatenate([P['wq'], P['wk'], P['wv']], axis=1))  # (32,96)
    wslab = put(wslab, W_WO, P['wo'])                                  # (32,32)
    wslab = put(wslab, W_WF1, P['wf1'])                                # (32,28)
    wslab = put(wslab, W_WF2, P['wf2'])                                # (28,32)

    # ---- aux slab: bias / LN rows + masks + segment / block-ones matrices
    def put_row(a, r, vec):
        vec = jnp.asarray(vec, f32).reshape(1, -1)
        return a.at[r:r + 1, :vec.shape[1]].set(vec)

    aux = jnp.zeros((AUX_ROWS, SLAB_W), f32)
    aux = put_row(aux, R_PB1, P['pb1']);   aux = put_row(aux, R_PG1, P['pg1'])
    aux = put_row(aux, R_PBT1, P['pbt1'])
    aux = put_row(aux, R_PB2, P['pb2']);   aux = put_row(aux, R_PG2, P['pg2'])
    aux = put_row(aux, R_PBT2, P['pbt2'])
    aux = put_row(aux, R_BQKV,
                  jnp.concatenate([P['bq'], P['bk'], P['bv']], axis=1))
    aux = put_row(aux, R_BO, P['bo'])
    aux = put_row(aux, R_LN1G, P['ln1g']); aux = put_row(aux, R_LN1B, P['ln1b'])
    aux = put_row(aux, R_BF1, P['bf1']);   aux = put_row(aux, R_BF2, P['bf2'])
    aux = put_row(aux, R_LN2G, P['ln2g']); aux = put_row(aux, R_LN2B, P['ln2b'])
    aux = put_row(aux, R_TW, jnp.reshape(jnp.asarray(transform_w, f32), (1,)))
    aux = put_row(aux, R_TB, jnp.reshape(jnp.asarray(transform_b, f32), (1,)))

    hmask = (jnp.arange(D_MODEL)[None, :] // HEAD_DIM
             == jnp.arange(NUM_HEADS)[:, None]).astype(f32)            # (H, D)
    aux = aux.at[R_HMASK:R_HMASK + NUM_HEADS, :D_MODEL].set(hmask)

    eye = jnp.eye(N_SAMP, dtype=f32)
    aux = aux.at[R_SEL1:R_SEL1 + BATCH, :N_SAMP].set(eye[:BATCH])
    aux = aux.at[R_SEL2:R_SEL2 + BATCH, :N_SAMP].set(eye[BATCH:])

    sample_id = jnp.repeat(jnp.arange(N_SAMP), SEQ_LEN)                # (M,)
    seg = (jnp.arange(N_SAMP)[:, None] == sample_id[None, :]).astype(f32)
    aux = aux.at[R_SEG:R_SEG + N_SAMP, :M_ROWS].set(seg)

    head_of_col = jnp.arange(HM) // M_ROWS
    blockones = (head_of_col[:, None] == head_of_col[None, :]).astype(f32)
    aux = aux.at[R_BLK:R_BLK + HM, :HM].set(blockones)

    # constants reused by the per-call wrapper
    same = sample_id[:, None] == sample_id[None, :]
    cross_bias = jnp.where(same, 0.0, -1e9).astype(f32)                # (M, M)
    cross_bias_tiled = jnp.tile(cross_bias, (1, NUM_HEADS))            # (M, 128)
    pe_tiled = jnp.tile(jnp.asarray(pe, f32), (N_SAMP, 1))             # (M, 28)

    return dict(wslab=wslab, aux=aux, seg=seg,
                cross_bias_tiled=cross_bias_tiled, pe_tiled=pe_tiled)


# ----------------------------------------------------------------------------
# Per-call forward: minimal host-side prep + single grid-less pallas_call.
# ----------------------------------------------------------------------------
@jax.jit
def abmap_forward(x1, x2, x1_mask, x2_mask, prep):
    x = jnp.concatenate([x1, x2], axis=0)                              # (N, L, F)
    mask = jnp.concatenate([x1_mask, x2_mask], axis=0).astype(jnp.float32)

    feat = x[:, :, :EMBED_DIM].reshape(M_ROWS, EMBED_DIM)
    pos4 = x[:, :, EMBED_DIM:].reshape(M_ROWS, FEAT_DIM - EMBED_DIM)
    add_term = jnp.concatenate([prep['pe_tiled'], pos4], axis=-1)      # (M, 32)

    counts = jnp.float32(SEQ_LEN) - jnp.sum(mask, axis=-1)             # (N,)
    seg_mean = prep['seg'] / counts[:, None]                           # (N, M)
    seg_mean = jnp.pad(seg_mean, ((0, ACT_ROWS - A_SEGM - N_SAMP), (0, 0)))

    acts = jnp.concatenate([feat, add_term, seg_mean], axis=0)         # (72, 32)

    # additive attention bias, tiled per head: 0 for (same sample, valid key),
    # ~-1e9 otherwise.
    key_pad = jnp.tile(mask.reshape(M_ROWS), (NUM_HEADS,))             # (128,)
    bias_all = prep['cross_bias_tiled'] + key_pad[None, :] * jnp.float32(-1e9)
    # TODO(synk): if M is ever scaled up, build this O(M * H*M) bias in-kernel
    # from the (M,) key-pad vector to keep the operand O(M) (v7x VMEM budget).

    out = pl.pallas_call(
        abmap_kernel,
        out_shape=jax.ShapeDtypeStruct((OUT_ROWS, OUT_W), jnp.float32),
    )(acts, bias_all, prep['wslab'], prep['aux'])

    z_all = out[:N_SAMP, :2 * D_MODEL]
    pred = out[N_SAMP:N_SAMP + BATCH, 0]
    return pred, z_all[:BATCH], z_all[BATCH:]


# ----------------------------------------------------------------------------
# PositionalEncoding1D (positional_encodings package) — value independent,
# computed once in NumPy (glue).
# ----------------------------------------------------------------------------
def positional_encoding_1d(seq_len, channels):
    ch = int(np.ceil(channels / 2) * 2)
    inv_freq = 1.0 / (10000.0 ** (np.arange(0, ch, 2, dtype=np.float64) / ch))
    pos = np.arange(seq_len, dtype=np.float64)
    sin_inp = pos[:, None] * inv_freq[None, :]
    emb = np.stack([np.sin(sin_inp), np.cos(sin_inp)], axis=-1).reshape(seq_len, ch)
    return jnp.asarray(emb[:, :channels], dtype=jnp.float32)


# ----------------------------------------------------------------------------
# Pure-JAX reference of the same forward (for verification).
# ----------------------------------------------------------------------------
def reference_forward(x1, x2, m1, m2, pe, P, tw, tb):
    def ln(x, g, b):
        mu = jnp.mean(x, axis=-1, keepdims=True)
        var = jnp.mean((x - mu) ** 2, axis=-1, keepdims=True)
        return (x - mu) / jnp.sqrt(var + LN_EPS) * g + b

    lrelu = lambda x: jnp.where(x >= 0, x, LRELU_SLOPE * x)

    def encode(x, m):
        feat, pos4 = x[:, :, :EMBED_DIM], x[:, :, EMBED_DIM:]
        h = lrelu(ln(feat @ P['pw1'] + P['pb1'][0], P['pg1'][0], P['pbt1'][0]))
        h = lrelu(ln(h @ P['pw2'] + P['pb2'][0], P['pg2'][0], P['pbt2'][0]))
        h = h + pe[None]
        s = jnp.concatenate([h, pos4], axis=-1)
        q = s @ P['wq'] + P['bq'][0]
        k = s @ P['wk'] + P['bk'][0]
        v = s @ P['wv'] + P['bv'][0]
        B, L, _ = s.shape
        qh = q.reshape(B, L, NUM_HEADS, HEAD_DIM).transpose(0, 2, 1, 3)
        kh = k.reshape(B, L, NUM_HEADS, HEAD_DIM).transpose(0, 2, 1, 3)
        vh = v.reshape(B, L, NUM_HEADS, HEAD_DIM).transpose(0, 2, 1, 3)
        sc = jnp.einsum('bhqd,bhkd->bhqk', qh, kh) / math.sqrt(HEAD_DIM)
        sc = sc + m[:, None, None, :] * (-1e9)
        p = jax.nn.softmax(sc, axis=-1)
        att = jnp.einsum('bhqk,bhkd->bhqd', p, vh).transpose(0, 2, 1, 3)
        att = att.reshape(B, L, D_MODEL) @ P['wo'] + P['bo'][0]
        s1 = ln(s + att, P['ln1g'][0], P['ln1b'][0])
        ff = jnp.maximum(s1 @ P['wf1'] + P['bf1'][0], 0.0) @ P['wf2'] + P['bf2'][0]
        s2 = ln(s1 + ff, P['ln2g'][0], P['ln2b'][0])
        count = (SEQ_LEN - jnp.sum(m, axis=-1))[:, None]
        mean_v = jnp.sum(s2, axis=1) / count
        lse_v = jnp.log(jnp.sum(jnp.exp(s2), axis=1))
        nz = lambda u: u / jnp.maximum(
            jnp.linalg.norm(u, axis=-1, keepdims=True), 1e-12)
        return jnp.concatenate([nz(mean_v), nz(lse_v)], axis=-1)

    z1 = encode(x1, m1)
    z2 = encode(x2, m2)
    dot = jnp.sum(z1 * z2, axis=-1)
    cs = dot / jnp.maximum(jnp.linalg.norm(z1, axis=-1) *
                           jnp.linalg.norm(z2, axis=-1), 1e-8)
    return cs * tw + tb, z1, z2


# ----------------------------------------------------------------------------
# Deterministic parameter construction (synthetic, matches module shapes).
# ----------------------------------------------------------------------------
def make_params(key):
    ks = jax.random.split(key, 16)
    rnd = lambda k, s, sc=0.1: (jax.random.normal(k, s) * sc).astype(jnp.float32)
    ones = lambda s: jnp.ones(s, jnp.float32)
    zeros = lambda s: jnp.zeros(s, jnp.float32)
    return {
        # self.project (embed_dim < 2048 branch)
        'pw1': rnd(ks[0], (EMBED_DIM, MID_DIM2)), 'pb1': rnd(ks[1], (1, MID_DIM2), 0.05),
        'pg1': ones((1, MID_DIM2)),               'pbt1': zeros((1, MID_DIM2)),
        'pw2': rnd(ks[2], (MID_DIM2, PROJ_DIM)),  'pb2': rnd(ks[3], (1, PROJ_DIM), 0.05),
        'pg2': ones((1, PROJ_DIM)),               'pbt2': zeros((1, PROJ_DIM)),
        # TransformerEncoderLayer (enc_layer_s — task 0)
        'wq': rnd(ks[4], (D_MODEL, D_MODEL)),  'bq': rnd(ks[5], (1, D_MODEL), 0.05),
        'wk': rnd(ks[6], (D_MODEL, D_MODEL)),  'bk': rnd(ks[7], (1, D_MODEL), 0.05),
        'wv': rnd(ks[8], (D_MODEL, D_MODEL)),  'bv': rnd(ks[9], (1, D_MODEL), 0.05),
        'wo': rnd(ks[10], (D_MODEL, D_MODEL)), 'bo': rnd(ks[11], (1, D_MODEL), 0.05),
        'ln1g': ones((1, D_MODEL)), 'ln1b': zeros((1, D_MODEL)),
        'wf1': rnd(ks[12], (D_MODEL, FF_DIM)), 'bf1': rnd(ks[13], (1, FF_DIM), 0.05),
        'wf2': rnd(ks[14], (FF_DIM, D_MODEL)), 'bf2': rnd(ks[15], (1, D_MODEL), 0.05),
        'ln2g': ones((1, D_MODEL)), 'ln2b': zeros((1, D_MODEL)),
    }


if __name__ == "__main__":
    key = jax.random.PRNGKey(0)
    k_in1, k_in2, k_ps, k_pf = jax.random.split(key, 4)

    # task = 0 -> attention_s / transform2_s ; task = 1 params also built.
    params_s = make_params(k_ps)
    params_f = make_params(k_pf)
    task = 0
    params = params_s if task == 0 else params_f

    # transform2_s / transform2_f : Linear(1,1) with weight=ones, bias=zeros.
    transform_w = jnp.ones((), jnp.float32)
    transform_b = jnp.zeros((), jnp.float32)

    pe = positional_encoding_1d(SEQ_LEN, PROJ_DIM)

    # One-time (model-load) packing of weights / constants into 2 slabs.
    prep = prepare_params(params, pe, transform_w, transform_b)
    prep = jax.tree_util.tree_map(jax.block_until_ready, prep)

    # Inputs: [batch, seq, embed_dim + 4] (last 4 columns = position features).
    x1 = jax.random.normal(k_in1, (BATCH, SEQ_LEN, FEAT_DIM), jnp.float32)
    x2 = jax.random.normal(k_in2, (BATCH, SEQ_LEN, FEAT_DIM), jnp.float32)

    # Padding masks (1.0 = padded), per-sample valid lengths.
    pos = jnp.arange(SEQ_LEN)[None, :]
    x1_mask = (pos >= jnp.array([8, 6])[:, None]).astype(jnp.float32)
    x2_mask = (pos >= jnp.array([7, 5])[:, None]).astype(jnp.float32)

    pred, z1, z2 = abmap_forward(x1, x2, x1_mask, x2_mask, prep)
    jax.block_until_ready((pred, z1, z2))

    # Verify against a pure-JAX reference of the same forward.
    pred_r, z1_r, z2_r = reference_forward(x1, x2, x1_mask, x2_mask, pe, params,
                                           transform_w, transform_b)
    np.testing.assert_allclose(np.asarray(pred), np.asarray(pred_r),
                               atol=2e-2, rtol=2e-2)
    np.testing.assert_allclose(np.asarray(z1), np.asarray(z1_r),
                               atol=2e-2, rtol=2e-2)
    np.testing.assert_allclose(np.asarray(z2), np.asarray(z2_r),
                               atol=2e-2, rtol=2e-2)

    # TODO(synk): training-mode Dropout(p=0.5) is omitted (eval semantics).
    print("KERNEL_OK")
</pallas_src>

<mosaic_0001>
module attributes {stable_mosaic.version = 11 : i64} {
  func.func @abmap_kernel(%arg0: memref<72x32xf32, #tpu.memory_space<vmem>>, %arg1: memref<32x128xf32, #tpu.memory_space<vmem>>, %arg2: memref<176x128xf32, #tpu.memory_space<vmem>>, %arg3: memref<160x128xf32, #tpu.memory_space<vmem>>, %arg4: memref<8x128xf32, #tpu.memory_space<vmem>>) attributes {dimension_semantics = [], scalar_prefetch = 0 : i64, scratch_operands = 0 : i64, tpu.core_type = #tpu.core_type<tc>} {
    %c0 = arith.constant 0 : index
    %c0_0 = arith.constant 0 : index
    %0 = vector.load %arg0[%c0, %c0_0] : memref<72x32xf32, #tpu.memory_space<vmem>>, vector<32x32xf32>
    %c32 = arith.constant 32 : index
    %c0_1 = arith.constant 0 : index
    %1 = vector.load %arg0[%c32, %c0_1] : memref<72x32xf32, #tpu.memory_space<vmem>>, vector<32x32xf32>
    %c64 = arith.constant 64 : index
    %c0_2 = arith.constant 0 : index
    %2 = vector.load %arg0[%c64, %c0_2] : memref<72x32xf32, #tpu.memory_space<vmem>>, vector<4x32xf32>
    %c0_3 = arith.constant 0 : index
    %c0_4 = arith.constant 0 : index
    %3 = vector.load %arg2[%c0_3, %c0_4] : memref<176x128xf32, #tpu.memory_space<vmem>>, vector<32x16xf32>
    %cst = arith.constant dense<0.000000e+00> : vector<32x16xf32>
    %4 = tpu.matmul %0, %3, %cst {dimension_numbers = #tpu.dot_dimension_numbers<[1], [0], [0], [1], [0, 0, 1, 1], [], []>} : vector<32x32xf32>, vector<32x16xf32>, vector<32x16xf32> -> vector<32x16xf32>
    %c0_5 = arith.constant 0 : index
    %c0_6 = arith.constant 0 : index
    %5 = vector.load %arg3[%c0_5, %c0_6] : memref<160x128xf32, #tpu.memory_space<vmem>>, vector<1x16xf32>
    %6 = vector.broadcast %5 : vector<1x16xf32> to vector<32x16xf32>
    %7 = arith.addf %4, %6 : vector<32x16xf32>
    %c1 = arith.constant 1 : index
    %c0_7 = arith.constant 0 : index
    %8 = vector.load %arg3[%c1, %c0_7] : memref<160x128xf32, #tpu.memory_space<vmem>>, vector<1x16xf32>
    %c2 = arith.constant 2 : index
    %c0_8 = arith.constant 0 : index
    %9 = vector.load %arg3[%c2, %c0_8] : memref<160x128xf32, #tpu.memory_space<vmem>>, vector<1x16xf32>
    %cst_9 = arith.constant dense<0.000000e+00> : vector<32xf32>
    %10 = vector.multi_reduction <add>, %7, %cst_9 [1] : vector<32x16xf32> to vector<32xf32>
    %11 = vector.shape_cast %10 : vector<32xf32> to vector<32x1xf32>
    %cst_10 = arith.constant 6.250000e-02 : f32
    %12 = vector.broadcast %cst_10 : f32 to vector<32x1xf32>
    %13 = arith.mulf %11, %12 : vector<32x1xf32>
    %14 = arith.mulf %7, %7 : vector<32x16xf32>
    %cst_11 = arith.constant dense<0.000000e+00> : vector<32xf32>
    %15 = vector.multi_reduction <add>, %14, %cst_11 [1] : vector<32x16xf32> to vector<32xf32>
    %16 = vector.shape_cast %15 : vector<32xf32> to vector<32x1xf32>
    %cst_12 = arith.constant 6.250000e-02 : f32
    %17 = vector.broadcast %cst_12 : f32 to vector<32x1xf32>
    %18 = arith.mulf %16, %17 : vector<32x1xf32>
    %19 = arith.mulf %13, %13 : vector<32x1xf32>
    %20 = arith.subf %18, %19 : vector<32x1xf32>
    %cst_13 = arith.constant 0.000000e+00 : f32
    %21 = vector.broadcast %cst_13 : f32 to vector<32x1xf32>
    %22 = arith.maximumf %20, %21 : vector<32x1xf32>
    %23 = vector.broadcast %13 : vector<32x1xf32> to vector<32x16xf32>
    %24 = arith.subf %7, %23 : vector<32x16xf32>
    %cst_14 = arith.constant 9.99999974E-6 : f32
    %25 = vector.broadcast %cst_14 : f32 to vector<32x1xf32>
    %26 = arith.addf %22, %25 : vector<32x1xf32>
    %27 = math.rsqrt %26 : vector<32x1xf32>
    %28 = vector.broadcast %27 : vector<32x1xf32> to vector<32x16xf32>
    %29 = arith.mulf %24, %28 : vector<32x16xf32>
    %30 = vector.broadcast %8 : vector<1x16xf32> to vector<32x16xf32>
    %31 = arith.mulf %29, %30 : vector<32x16xf32>
    %32 = vector.broadcast %9 : vector<1x16xf32> to vector<32x16xf32>
    %33 = arith.addf %31, %32 : vector<32x16xf32>
    %cst_15 = arith.constant 0.000000e+00 : f32
    %34 = vector.broadcast %cst_15 : f32 to vector<32x16xf32>
    %35 = arith.cmpf oge, %33, %34 : vector<32x16xf32>
    %cst_16 = arith.constant 0.00999999977 : f32
    %36 = vector.broadcast %cst_16 : f32 to vector<32x16xf32>
    %37 = arith.mulf %36, %33 : vector<32x16xf32>
    %38 = arith.select %35, %33, %37 : vector<32x16xi1>, vector<32x16xf32>
    %c32_17 = arith.constant 32 : index
    %c0_18 = arith.constant 0 : index
    %39 = vector.load %arg2[%c32_17, %c0_18] : memref<176x128xf32, #tpu.memory_space<vmem>>, vector<16x32xf32>
    %cst_19 = arith.constant dense<0.000000e+00> : vector<32x32xf32>
    %40 = tpu.matmul %38, %39, %cst_19 {dimension_numbers = #tpu.dot_dimension_numbers<[1], [0], [0], [1], [0, 0, 1, 1], [], []>} : vector<32x16xf32>, vector<16x32xf32>, vector<32x32xf32> -> vector<32x32xf32>
    %c3 = arith.constant 3 : index
    %c0_20 = arith.constant 0 : index
    %41 = vector.load %arg3[%c3, %c0_20] : memref<160x128xf32, #tpu.memory_space<vmem>>, vector<1x32xf32>
    %42 = vector.broadcast %41 : vector<1x32xf32> to vector<32x32xf32>
    %43 = arith.addf %40, %42 : vector<32x32xf32>
    %c4 = arith.constant 4 : index
    %c0_21 = arith.constant 0 : index
    %44 = vector.load %arg3[%c4, %c0_21] : memref<160x128xf32, #tpu.memory_space<vmem>>, vector<1x32xf32>
    %c5 = arith.constant 5 : index
    %c0_22 = arith.constant 0 : index
    %45 = vector.load %arg3[%c5, %c0_22] : memref<160x128xf32, #tpu.memory_space<vmem>>, vector<1x32xf32>
    %cst_23 = arith.constant dense<0.000000e+00> : vector<32xf32>
    %46 = vector.multi_reduction <add>, %43, %cst_23 [1] : vector<32x32xf32> to vector<32xf32>
    %47 = vector.shape_cast %46 : vector<32xf32> to vector<32x1xf32>
    %cst_24 = arith.constant 0.0357142873 : f32
    %48 = vector.broadcast %cst_24 : f32 to vector<32x1xf32>
    %49 = arith.mulf %47, %48 : vector<32x1xf32>
    %50 = arith.mulf %43, %43 : vector<32x32xf32>
    %cst_25 = arith.constant dense<0.000000e+00> : vector<32xf32>
    %51 = vector.multi_reduction <add>, %50, %cst_25 [1] : vector<32x32xf32> to vector<32xf32>
    %52 = vector.shape_cast %51 : vector<32xf32> to vector<32x1xf32>
    %cst_26 = arith.constant 0.0357142873 : f32
    %53 = vector.broadcast %cst_26 : f32 to vector<32x1xf32>
    %54 = arith.mulf %52, %53 : vector<32x1xf32>
    %55 = arith.mulf %49, %49 : vector<32x1xf32>
    %56 = arith.subf %54, %55 : vector<32x1xf32>
    %cst_27 = arith.constant 0.000000e+00 : f32
    %57 = vector.broadcast %cst_27 : f32 to vector<32x1xf32>
    %58 = arith.maximumf %56, %57 : vector<32x1xf32>
    %59 = vector.broadcast %49 : vector<32x1xf32> to vector<32x32xf32>
    %60 = arith.subf %43, %59 : vector<32x32xf32>
    %cst_28 = arith.constant 9.99999974E-6 : f32
    %61 = vector.broadcast %cst_28 : f32 to vector<32x1xf32>
    %62 = arith.addf %58, %61 : vector<32x1xf32>
    %63 = math.rsqrt %62 : vector<32x1xf32>
    %64 = vector.broadcast %63 : vector<32x1xf32> to vector<32x32xf32>
    %65 = arith.mulf %60, %64 : vector<32x32xf32>
    %66 = vector.broadcast %44 : vector<1x32xf32> to vector<32x32xf32>
    %67 = arith.mulf %65, %66 : vector<32x32xf32>
    %68 = vector.broadcast %45 : vector<1x32xf32> to vector<32x32xf32>
    %69 = arith.addf %67, %68 : vector<32x32xf32>
    %cst_29 = arith.constant 0.000000e+00 : f32
    %70 = vector.broadcast %cst_29 : f32 to vector<32x32xf32>
    %71 = arith.cmpf oge, %69, %70 : vector<32x32xf32>
    %cst_30 = arith.constant 0.00999999977 : f32
    %72 = vector.broadcast %cst_30 : f32 to vector<32x32xf32>
    %73 = arith.mulf %72, %69 : vector<32x32xf32>
    %74 = arith.select %71, %69, %73 : vector<32x32xi1>, vector<32x32xf32>
    %75 = arith.addf %74, %1 : vector<32x32xf32>
    %c48 = arith.constant 48 : index
    %c0_31 = arith.constant 0 : index
    %76 = vector.load %arg2[%c48, %c0_31] : memref<176x128xf32, #tpu.memory_space<vmem>>, vector<32x96xf32>
    %cst_32 = arith.constant dense<0.000000e+00> : vector<32x96xf32>
    %77 = tpu.matmul %75, %76, %cst_32 {dimension_numbers = #tpu.dot_dimension_numbers<[1], [0], [0], [1], [0, 0, 1, 1], [], []>} : vector<32x32xf32>, vector<32x96xf32>, vector<32x96xf32> -> vector<32x96xf32>
    %c6 = arith.constant 6 : index
    %c0_33 = arith.constant 0 : index
    %78 = vector.load %arg3[%c6, %c0_33] : memref<160x128xf32, #tpu.memory_space<vmem>>, vector<1x96xf32>
    %79 = vector.broadcast %78 : vector<1x96xf32> to vector<32x96xf32>
    %80 = arith.addf %77, %79 : vector<32x96xf32>
    %81 = vector.extract_strided_slice %80 {offsets = [0, 0], sizes = [32, 32], strides = [1, 1]} : vector<32x96xf32> to vector<32x32xf32>
    %82 = vector.extract_strided_slice %80 {offsets = [0, 32], sizes = [32, 32], strides = [1, 1]} : vector<32x96xf32> to vector<32x32xf32>
    %83 = vector.extract_strided_slice %80 {offsets = [0, 64], sizes = [32, 32], strides = [1, 1]} : vector<32x96xf32> to vector<32x32xf32>
    %c16 = arith.constant 16 : index
    %c0_34 = arith.constant 0 : index
    %84 = vector.load %arg3[%c16, %c0_34] : memref<160x128xf32, #tpu.memory_space<vmem>>, vector<1x32xf32>
    %85 = vector.broadcast %84 : vector<1x32xf32> to vector<32x32xf32>
    %86 = arith.mulf %82, %85 : vector<32x32xf32>
    %c17 = arith.constant 17 : index
    %c0_35 = arith.constant 0 : index
    %87 = vector.load %arg3[%c17, %c0_35] : memref<160x128xf32, #tpu.memory_space<vmem>>, vector<1x32xf32>
    %88 = vector.broadcast %87 : vector<1x32xf32> to vector<32x32xf32>
    %89 = arith.mulf %82, %88 : vector<32x32xf32>
    %c18 = arith.constant 18 : index
    %c0_36 = arith.constant 0 : index
    %90 = vector.load %arg3[%c18, %c0_36] : memref<160x128xf32, #tpu.memory_space<vmem>>, vector<1x32xf32>
    %91 = vector.broadcast %90 : vector<1x32xf32> to vector<32x32xf32>
    %92 = arith.mulf %82, %91 : vector<32x32xf32>
    %c19 = arith.constant 19 : index
    %c0_37 = arith.constant 0 : index
    %93 = vector.load %arg3[%c19, %c0_37] : memref<160x128xf32, #tpu.memory_space<vmem>>, vector<1x32xf32>
    %94 = vector.broadcast %93 : vector<1x32xf32> to vector<32x32xf32>
    %95 = arith.mulf %82, %94 : vector<32x32xf32>
    %96 = tpu.concatenate %86, %89, %92, %95 in 0 : vector<32x32xf32>, vector<32x32xf32>, vector<32x32xf32>, vector<32x32xf32> -> vector<128x32xf32>
    %c16_38 = arith.constant 16 : index
    %c0_39 = arith.constant 0 : index
    %97 = vector.load %arg3[%c16_38, %c0_39] : memref<160x128xf32, #tpu.memory_space<vmem>>, vector<1x32xf32>
    %98 = vector.broadcast %97 : vector<1x32xf32> to vector<32x32xf32>
    %99 = arith.mulf %83, %98 : vector<32x32xf32>
    %c17_40 = arith.constant 17 : index
    %c0_41 = arith.constant 0 : index
    %100 = vector.load %arg3[%c17_40, %c0_41] : memref<160x128xf32, #tpu.memory_space<vmem>>, vector<1x32xf32>
    %101 = vector.broadcast %100 : vector<1x32xf32> to vector<32x32xf32>
    %102 = arith.mulf %83, %101 : vector<32x32xf32>
    %c18_42 = arith.constant 18 : index
    %c0_43 = arith.constant 0 : index
    %103 = vector.load %arg3[%c18_42, %c0_43] : memref<160x128xf32, #tpu.memory_space<vmem>>, vector<1x32xf32>
    %104 = vector.broadcast %103 : vector<1x32xf32> to vector<32x32xf32>
    %105 = arith.mulf %83, %104 : vector<32x32xf32>
    %c19_44 = arith.constant 19 : index
    %c0_45 = arith.constant 0 : index
    %106 = vector.load %arg3[%c19_44, %c0_45] : memref<160x128xf32, #tpu.memory_space<vmem>>, vector<1x32xf32>
    %107 = vector.broadcast %106 : vector<1x32xf32> to vector<32x32xf32>
    %108 = arith.mulf %83, %107 : vector<32x32xf32>
    %109 = tpu.concatenate %99, %102, %105, %108 in 0 : vector<32x32xf32>, vector<32x32xf32>, vector<32x32xf32>, vector<32x32xf32> -> vector<128x32xf32>
    %cst_46 = arith.constant dense<0.000000e+00> : vector<32x128xf32>
    %110 = tpu.matmul %81, %96, %cst_46 {dimension_numbers = #tpu.dot_dimension_numbers<[1], [1], [0], [0], [0, 0, 1, 0], [], []>} : vector<32x32xf32>, vector<128x32xf32>, vector<32x128xf32> -> vector<32x128xf32>
    %cst_47 = arith.constant 0.353553385 : f32
    %111 = vector.broadcast %cst_47 : f32 to vector<32x128xf32>
    %112 = arith.mulf %110, %111 : vector<32x128xf32>
    %c0_48 = arith.constant 0 : index
    %c0_49 = arith.constant 0 : index
    %113 = vector.load %arg1[%c0_48, %c0_49] : memref<32x128xf32, #tpu.memory_space<vmem>>, vector<32x128xf32>
    %114 = arith.addf %112, %113 : vector<32x128xf32>
    %cst_50 = arith.constant dense<0xFF800000> : vector<32xf32>
    %115 = vector.multi_reduction <maximumf>, %114, %cst_50 [1] : vector<32x128xf32> to vector<32xf32>
    %116 = vector.shape_cast %115 : vector<32xf32> to vector<32x1xf32>
    %117 = vector.broadcast %116 : vector<32x1xf32> to vector<32x128xf32>
    %118 = arith.subf %114, %117 : vector<32x128xf32>
    %119 = math.exp %118 : vector<32x128xf32>
    %c32_51 = arith.constant 32 : index
    %c0_52 = arith.constant 0 : index
    %120 = vector.load %arg3[%c32_51, %c0_52] : memref<160x128xf32, #tpu.memory_space<vmem>>, vector<128x128xf32>
    %cst_53 = arith.constant dense<0.000000e+00> : vector<32x128xf32>
    %121 = tpu.matmul %119, %120, %cst_53 {dimension_numbers = #tpu.dot_dimension_numbers<[1], [0], [0], [1], [0, 0, 1, 1], [], []>} : vector<32x128xf32>, vector<128x128xf32>, vector<32x128xf32> -> vector<32x128xf32>
    %122 = tpu.reciprocal %121 {approx = true} : vector<32x128xf32> -> vector<32x128xf32>
    %123 = arith.mulf %119, %122 : vector<32x128xf32>
    %cst_54 = arith.constant dense<0.000000e+00> : vector<32x32xf32>
    %124 = tpu.matmul %123, %109, %cst_54 {dimension_numbers = #tpu.dot_dimension_numbers<[1], [0], [0], [1], [0, 0, 1, 1], [], []>} : vector<32x128xf32>, vector<128x32xf32>, vector<32x32xf32> -> vector<32x32xf32>
    %c80 = arith.constant 80 : index
    %c0_55 = arith.constant 0 : index
    %125 = vector.load %arg2[%c80, %c0_55] : memref<176x128xf32, #tpu.memory_space<vmem>>, vector<32x32xf32>
    %cst_56 = arith.constant dense<0.000000e+00> : vector<32x32xf32>
    %126 = tpu.matmul %124, %125, %cst_56 {dimension_numbers = #tpu.dot_dimension_numbers<[1], [0], [0], [1], [0, 0, 1, 1], [], []>} : vector<32x32xf32>, vector<32x32xf32>, vector<32x32xf32> -> vector<32x32xf32>
    %c7 = arith.constant 7 : index
    %c0_57 = arith.constant 0 : index
    %127 = vector.load %arg3[%c7, %c0_57] : memref<160x128xf32, #tpu.memory_space<vmem>>, vector<1x32xf32>
    %128 = vector.broadcast %127 : vector<1x32xf32> to vector<32x32xf32>
    %129 = arith.addf %126, %128 : vector<32x32xf32>
    %130 = arith.addf %75, %129 : vector<32x32xf32>
    %c8 = arith.constant 8 : index
    %c0_58 = arith.constant 0 : index
    %131 = vector.load %arg3[%c8, %c0_58] : memref<160x128xf32, #tpu.memory_space<vmem>>, vector<1x32xf32>
    %c9 = arith.constant 9 : index
    %c0_59 = arith.constant 0 : index
    %132 = vector.load %arg3[%c9, %c0_59] : memref<160x128xf32, #tpu.memory_space<vmem>>, vector<1x32xf32>
    %cst_60 = arith.constant dense<0.000000e+00> : vector<32xf32>
    %133 = vector.multi_reduction <add>, %130, %cst_60 [1] : vector<32x32xf32> to vector<32xf32>
    %134 = vector.shape_cast %133 : vector<32xf32> to vector<32x1xf32>
    %cst_61 = arith.constant 3.125000e-02 : f32
    %135 = vector.broadcast %cst_61 : f32 to vector<32x1xf32>
    %136 = arith.mulf %134, %135 : vector<32x1xf32>
    %137 = arith.mulf %130, %130 : vector<32x32xf32>
    %cst_62 = arith.constant dense<0.000000e+00> : vector<32xf32>
    %138 = vector.multi_reduction <add>, %137, %cst_62 [1] : vector<32x32xf32> to vector<32xf32>
    %139 = vector.shape_cast %138 : vector<32xf32> to vector<32x1xf32>
    %cst_63 = arith.constant 3.125000e-02 : f32
    %140 = vector.broadcast %cst_63 : f32 to vector<32x1xf32>
    %141 = arith.mulf %139, %140 : vector<32x1xf32>
    %142 = arith.mulf %136, %136 : vector<32x1xf32>
    %143 = arith.subf %141, %142 : vector<32x1xf32>
    %cst_64 = arith.constant 0.000000e+00 : f32
    %144 = vector.broadcast %cst_64 : f32 to vector<32x1xf32>
    %145 = arith.maximumf %143, %144 : vector<32x1xf32>
    %146 = vector.broadcast %136 : vector<32x1xf32> to vector<32x32xf32>
    %147 = arith.subf %130, %146 : vector<32x32xf32>
    %cst_65 = arith.constant 9.99999974E-6 : f32
    %148 = vector.broadcast %cst_65 : f32 to vector<32x1xf32>
    %149 = arith.addf %145, %148 : vector<32x1xf32>
    %150 = math.rsqrt %149 : vector<32x1xf32>
    %151 = vector.broadcast %150 : vector<32x1xf32> to vector<32x32xf32>
    %152 = arith.mulf %147, %151 : vector<32x32xf32>
    %153 = vector.broadcast %131 : vector<1x32xf32> to vector<32x32xf32>
    %154 = arith.mulf %152, %153 : vector<32x32xf32>
    %155 = vector.broadcast %132 : vector<1x32xf32> to vector<32x32xf32>
    %156 = arith.addf %154, %155 : vector<32x32xf32>
    %c112 = arith.constant 112 : index
    %c0_66 = arith.constant 0 : index
    %157 = vector.load %arg2[%c112, %c0_66] : memref<176x128xf32, #tpu.memory_space<vmem>>, vector<32x28xf32>
    %cst_67 = arith.constant dense<0.000000e+00> : vector<32x28xf32>
    %158 = tpu.matmul %156, %157, %cst_67 {dimension_numbers = #tpu.dot_dimension_numbers<[1], [0], [0], [1], [0, 0, 1, 1], [], []>} : vector<32x32xf32>, vector<32x28xf32>, vector<32x28xf32> -> vector<32x28xf32>
    %c10 = arith.constant 10 : index
    %c0_68 = arith.constant 0 : index
    %159 = vector.load %arg3[%c10, %c0_68] : memref<160x128xf32, #tpu.memory_space<vmem>>, vector<1x28xf32>
    %160 = vector.broadcast %159 : vector<1x28xf32> to vector<32x28xf32>
    %161 = arith.addf %158, %160 : vector<32x28xf32>
    %cst_69 = arith.constant 0.000000e+00 : f32
    %162 = vector.broadcast %cst_69 : f32 to vector<32x28xf32>
    %163 = arith.maximumf %161, %162 : vector<32x28xf32>
    %c144 = arith.constant 144 : index
    %c0_70 = arith.constant 0 : index
    %164 = vector.load %arg2[%c144, %c0_70] : memref<176x128xf32, #tpu.memory_space<vmem>>, vector<28x32xf32>
    %cst_71 = arith.constant dense<0.000000e+00> : vector<32x32xf32>
    %165 = tpu.matmul %163, %164, %cst_71 {dimension_numbers = #tpu.dot_dimension_numbers<[1], [0], [0], [1], [0, 0, 1, 1], [], []>} : vector<32x28xf32>, vector<28x32xf32>, vector<32x32xf32> -> vector<32x32xf32>
    %c11 = arith.constant 11 : index
    %c0_72 = arith.constant 0 : index
    %166 = vector.load %arg3[%c11, %c0_72] : memref<160x128xf32, #tpu.memory_space<vmem>>, vector<1x32xf32>
    %167 = vector.broadcast %166 : vector<1x32xf32> to vector<32x32xf32>
    %168 = arith.addf %165, %167 : vector<32x32xf32>
    %169 = arith.addf %156, %168 : vector<32x32xf32>
    %c12 = arith.constant 12 : index
    %c0_73 = arith.constant 0 : index
    %170 = vector.load %arg3[%c12, %c0_73] : memref<160x128xf32, #tpu.memory_space<vmem>>, vector<1x32xf32>
    %c13 = arith.constant 13 : index
    %c0_74 = arith.constant 0 : index
    %171 = vector.load %arg3[%c13, %c0_74] : memref<160x128xf32, #tpu.memory_space<vmem>>, vector<1x32xf32>
    %cst_75 = arith.constant dense<0.000000e+00> : vector<32xf32>
    %172 = vector.multi_reduction <add>, %169, %cst_75 [1] : vector<32x32xf32> to vector<32xf32>
    %173 = vector.shape_cast %172 : vector<32xf32> to vector<32x1xf32>
    %cst_76 = arith.constant 3.125000e-02 : f32
    %174 = vector.broadcast %cst_76 : f32 to vector<32x1xf32>
    %175 = arith.mulf %173, %174 : vector<32x1xf32>
    %176 = arith.mulf %169, %169 : vector<32x32xf32>
    %cst_77 = arith.constant dense<0.000000e+00> : vector<32xf32>
    %177 = vector.multi_reduction <add>, %176, %cst_77 [1] : vector<32x32xf32> to vector<32xf32>
    %178 = vector.shape_cast %177 : vector<32xf32> to vector<32x1xf32>
    %cst_78 = arith.constant 3.125000e-02 : f32
    %179 = vector.broadcast %cst_78 : f32 to vector<32x1xf32>
    %180 = arith.mulf %178, %179 : vector<32x1xf32>
    %181 = arith.mulf %175, %175 : vector<32x1xf32>
    %182 = arith.subf %180, %181 : vector<32x1xf32>
    %cst_79 = arith.constant 0.000000e+00 : f32
    %183 = vector.broadcast %cst_79 : f32 to vector<32x1xf32>
    %184 = arith.maximumf %182, %183 : vector<32x1xf32>
    %185 = vector.broadcast %175 : vector<32x1xf32> to vector<32x32xf32>
    %186 = arith.subf %169, %185 : vector<32x32xf32>
    %cst_80 = arith.constant 9.99999974E-6 : f32
    %187 = vector.broadcast %cst_80 : f32 to vector<32x1xf32>
    %188 = arith.addf %184, %187 : vector<32x1xf32>
    %189 = math.rsqrt %188 : vector<32x1xf32>
    %190 = vector.broadcast %189 : vector<32x1xf32> to vector<32x32xf32>
    %191 = arith.mulf %186, %190 : vector<32x32xf32>
    %192 = vector.broadcast %170 : vector<1x32xf32> to vector<32x32xf32>
    %193 = arith.mulf %191, %192 : vector<32x32xf32>
    %194 = vector.broadcast %171 : vector<1x32xf32> to vector<32x32xf32>
    %195 = arith.addf %193, %194 : vector<32x32xf32>
    %c24 = arith.constant 24 : index
    %c0_81 = arith.constant 0 : index
    %196 = vector.load %arg3[%c24, %c0_81] : memref<160x128xf32, #tpu.memory_space<vmem>>, vector<4x32xf32>
    %cst_82 = arith.constant dense<0.000000e+00> : vector<4x32xf32>
    %197 = tpu.matmul %2, %195, %cst_82 {dimension_numbers = #tpu.dot_dimension_numbers<[1], [0], [0], [1], [0, 0, 1, 1], [], []>} : vector<4x32xf32>, vector<32x32xf32>, vector<4x32xf32> -> vector<4x32xf32>
    %198 = math.exp %195 : vector<32x32xf32>
    %cst_83 = arith.constant dense<0.000000e+00> : vector<4x32xf32>
    %199 = tpu.matmul %196, %198, %cst_83 {dimension_numbers = #tpu.dot_dimension_numbers<[1], [0], [0], [1], [0, 0, 1, 1], [], []>} : vector<4x32xf32>, vector<32x32xf32>, vector<4x32xf32> -> vector<4x32xf32>
    %200 = math.log %199 : vector<4x32xf32>
    %201 = arith.mulf %197, %197 : vector<4x32xf32>
    %cst_84 = arith.constant dense<0.000000e+00> : vector<4xf32>
    %202 = vector.multi_reduction <add>, %201, %cst_84 [1] : vector<4x32xf32> to vector<4xf32>
    %203 = vector.shape_cast %202 : vector<4xf32> to vector<4x1xf32>
    %204 = math.sqrt %203 : vector<4x1xf32>
    %cst_85 = arith.constant 9.99999996E-13 : f32
    %205 = vector.broadcast %cst_85 : f32 to vector<4x1xf32>
    %206 = arith.maximumf %204, %205 : vector<4x1xf32>
    %207 = tpu.reciprocal %206 {approx = true} : vector<4x1xf32> -> vector<4x1xf32>
    %208 = vector.broadcast %207 : vector<4x1xf32> to vector<4x32xf32>
    %209 = arith.mulf %197, %208 : vector<4x32xf32>
    %210 = arith.mulf %200, %200 : vector<4x32xf32>
    %cst_86 = arith.constant dense<0.000000e+00> : vector<4xf32>
    %211 = vector.multi_reduction <add>, %210, %cst_86 [1] : vector<4x32xf32> to vector<4xf32>
    %212 = vector.shape_cast %211 : vector<4xf32> to vector<4x1xf32>
    %213 = math.sqrt %212 : vector<4x1xf32>
    %cst_87 = arith.constant 9.99999996E-13 : f32
    %214 = vector.broadcast %cst_87 : f32 to vector<4x1xf32>
    %215 = arith.maximumf %213, %214 : vector<4x1xf32>
    %216 = tpu.reciprocal %215 {approx = true} : vector<4x1xf32> -> vector<4x1xf32>
    %217 = vector.broadcast %216 : vector<4x1xf32> to vector<4x32xf32>
    %218 = arith.mulf %200, %217 : vector<4x32xf32>
    %219 = tpu.concatenate %209, %218 in 1 : vector<4x32xf32>, vector<4x32xf32> -> vector<4x64xf32>
    %c20 = arith.constant 20 : index
    %c0_88 = arith.constant 0 : index
    %220 = vector.load %arg3[%c20, %c0_88] : memref<160x128xf32, #tpu.memory_space<vmem>>, vector<2x4xf32>
    %cst_89 = arith.constant dense<0.000000e+00> : vector<2x64xf32>
    %221 = tpu.matmul %220, %219, %cst_89 {dimension_numbers = #tpu.dot_dimension_numbers<[1], [0], [0], [1], [0, 0, 1, 1], [], []>} : vector<2x4xf32>, vector<4x64xf32>, vector<2x64xf32> -> vector<2x64xf32>
    %c22 = arith.constant 22 : index
    %c0_90 = arith.constant 0 : index
    %222 = vector.load %arg3[%c22, %c0_90] : memref<160x128xf32, #tpu.memory_space<vmem>>, vector<2x4xf32>
    %cst_91 = arith.constant dense<0.000000e+00> : vector<2x64xf32>
    %223 = tpu.matmul %222, %219, %cst_91 {dimension_numbers = #tpu.dot_dimension_numbers<[1], [0], [0], [1], [0, 0, 1, 1], [], []>} : vector<2x4xf32>, vector<4x64xf32>, vector<2x64xf32> -> vector<2x64xf32>
    %224 = arith.mulf %221, %223 : vector<2x64xf32>
    %cst_92 = arith.constant dense<0.000000e+00> : vector<2xf32>
    %225 = vector.multi_reduction <add>, %224, %cst_92 [1] : vector<2x64xf32> to vector<2xf32>
    %226 = vector.shape_cast %225 : vector<2xf32> to vector<2x1xf32>
    %227 = arith.mulf %221, %221 : vector<2x64xf32>
    %cst_93 = arith.constant dense<0.000000e+00> : vector<2xf32>
    %228 = vector.multi_reduction <add>, %227, %cst_93 [1] : vector<2x64xf32> to vector<2xf32>
    %229 = vector.shape_cast %228 : vector<2xf32> to vector<2x1xf32>
    %230 = math.sqrt %229 : vector<2x1xf32>
    %231 = arith.mulf %223, %223 : vector<2x64xf32>
    %cst_94 = arith.constant dense<0.000000e+00> : vector<2xf32>
    %232 = vector.multi_reduction <add>, %231, %cst_94 [1] : vector<2x64xf32> to vector<2xf32>
    %233 = vector.shape_cast %232 : vector<2xf32> to vector<2x1xf32>
    %234 = math.sqrt %233 : vector<2x1xf32>
    %235 = arith.mulf %230, %234 : vector<2x1xf32>
    %cst_95 = arith.constant 9.99999993E-9 : f32
    %236 = vector.broadcast %cst_95 : f32 to vector<2x1xf32>
    %237 = arith.maximumf %235, %236 : vector<2x1xf32>
    %238 = arith.divf %226, %237 : vector<2x1xf32>
    %c14 = arith.constant 14 : index
    %c0_96 = arith.constant 0 : index
    %239 = vector.load %arg3[%c14, %c0_96] : memref<160x128xf32, #tpu.memory_space<vmem>>, vector<1x1xf32>
    %240 = vector.broadcast %239 : vector<1x1xf32> to vector<2x1xf32>
    %241 = arith.mulf %238, %240 : vector<2x1xf32>
    %c15 = arith.constant 15 : index
    %c0_97 = arith.constant 0 : index
    %242 = vector.load %arg3[%c15, %c0_97] : memref<160x128xf32, #tpu.memory_space<vmem>>, vector<1x1xf32>
    %243 = vector.broadcast %242 : vector<1x1xf32> to vector<2x1xf32>
    %244 = arith.addf %241, %243 : vector<2x1xf32>
    %cst_98 = arith.constant 0.000000e+00 : f32
    %245 = vector.broadcast %cst_98 : f32 to vector<8x128xf32>
    %c0_99 = arith.constant 0 : index
    %c0_100 = arith.constant 0 : index
    %246 = vector.load %arg4[%c0_99, %c0_100] : memref<8x128xf32, #tpu.memory_space<vmem>>, vector<8x128xf32>
    tpu.vector_store %arg4[%c0_99, %c0_100], %245 {strides = array<i32>} : memref<8x128xf32, #tpu.memory_space<vmem>>, vector<8x128xf32>,
    %cst_101 = arith.constant 0.000000e+00 : f32
    %247 = vector.broadcast %cst_101 : f32 to vector<4x64xf32>
    %248 = tpu.concatenate %219, %247 in 1 : vector<4x64xf32>, vector<4x64xf32> -> vector<4x128xf32>
    %c0_102 = arith.constant 0 : index
    %c0_103 = arith.constant 0 : index
    %249 = vector.load %arg4[%c0_102, %c0_103] : memref<8x128xf32, #tpu.memory_space<vmem>>, vector<4x128xf32>
    tpu.vector_store %arg4[%c0_102, %c0_103], %248 {strides = array<i32>} : memref<8x128xf32, #tpu.memory_space<vmem>>, vector<4x128xf32>,
    %250 = vector.shape_cast %244 : vector<2x1xf32> to vector<2x1xf32>
    %251 = vector.broadcast %250 : vector<2x1xf32> to vector<2x128xf32>
    %c4_104 = arith.constant 4 : index
    %c0_105 = arith.constant 0 : index
    %252 = vector.load %arg4[%c4_104, %c0_105] : memref<8x128xf32, #tpu.memory_space<vmem>>, vector<2x128xf32>
    tpu.vector_store %arg4[%c4_104, %c0_105], %251 {strides = array<i32>} : memref<8x128xf32, #tpu.memory_space<vmem>>, vector<2x128xf32>,
    return
  }
}

</mosaic_0001>

<bundles_post_ra>
// kernel: abmap_forward.1
= control target key start
LH: loop header
LB: loop body
LE: loop exit
PB: predicated region body
PF: predicated region fallthrough
CT: control target
= control target key end

     0   :  { %vm35_vm0 = vcmask 261120   ;;  %vm135_vm1 = vcmask 130048   ;;  %s2731_s27 = smov 32   ;;  %s2732_s22 = smov 96   ;;  %vm1407_vm11 = vcmask 1043456   ;;  %vm2734_vm12 = vmmov 1   ;;  %s3323_s2 = inlined_call_operand.vmem [shape: f32[176,128], index: 2, kind: input, shape index: {}]   ;;  %s3324_s0 = inlined_call_operand.vmem [shape: f32[72,32], index: 0, kind: input, shape index: {}]   ;;  %s3325_s3 = inlined_call_operand.vmem [shape: f32[160,128], index: 3, kind: input, shape index: {}]   ;;  %s3326_s1 = inlined_call_operand.vmem [shape: f32[32,128], index: 1, kind: input, shape index: {}]   ;;  %s3327_s4 = inlined_call_operand.vmem [shape: f32[8,128], index: 4, kind: output, shape index: {}]  }
   0x1   :  { %v26_v0 = vld [vmem:[%s3323_s2] sm:$0xff]  ;;  %v27_v1 = vld [vmem:[%s3323_s2 + $0x8] sm:$0xff]  ;;  %v28_v2 = vld [vmem:[%s3323_s2 + $0x10] sm:$0xff]  ;;  %s2733_s26 = smov 64   ;;  %vm1394_vm14 = vcmask 228352   ;;  %vm2736_vm15 = vmmov 0  }
   0x2   :  { %v2399_v3 = vpack.c.bf16 %v27_v1, %v26_v0  ;;  %v29_v4 = vld [vmem:[%s3323_s2 + $0x18] sm:$0xff]  ;;  %v17_v5 = vld [vmem:[%s3324_s0] sm:$0xff]  ;;  %v18_v7 = vld [vmem:[%s3324_s0 + $0x8] sm:$0xff] }
   0x3   :  { %v2403_v6 = vpack.c.bf16 %v29_v4, %v28_v2  ;;  %2181 = vmatprep.mubr.msk.f32.mxu0 %vm35_vm0, %v17_v5  ;;  %v19_v8 = vld [vmem:[%s3324_s0 + $0x10] sm:$0xff]  ;;  %v20_v9 = vld [vmem:[%s3324_s0 + $0x18] sm:$0xff]  ;;  %v1982_v10 = vld [vmem:[%s3325_s3] ss:$0 sm:$0xff] }
   0x4   :  { %2400 = vmatprep.subr.bf16.mxu0 %v2399_v3  ;;  %v228_v31 = vld [vmem:[%s3323_s2 + $0x20] sm:$0xff]  ;;  %v229_v32 = vld [vmem:[%s3323_s2 + $0x28] sm:$0xff]  ;;  %vm2991_vm10 = vmpackc.low %vm35_vm0, %vm35_vm0 }
   0x5   :  { %2402 = vmatpush3.bf16.msra.mxu0 %v2399_v3  ;;  %v2407_v33 = vpack.c.bf16 %v229_v32, %v228_v31  ;;  %v1987_v4 = vld [vmem:[%s3325_s3 + $0x1] ss:$0 sm:$0xff]  ;;  %v1989_v32 = vld [vmem:[%s3325_s3 + $0x3] ss:$0 sm:$0xff]  ;;  %vm2552_vm13 = vmpackc.low %vm1407_vm11, %vm2734_vm12 }
   0x6   :  { %2404 = vmatprep.subr.bf16.mxu0 %v2403_v6 }
   0x7   :  { %2408 = vmatprep.subr.bf16.mxu1 %v2407_v33 }
   0x8   :  { %2410 = vmatpush3.bf16.msra.mxu1 %v2407_v33 }
   0x9   :  { %2406 = vmatpush3.bf16.msra.mxu0 %v2403_v6  ;;  %v1988_v6 = vld [vmem:[%s3325_s3 + $0x2] ss:$0 sm:$0xff] }
   0xc   :  { %2182 = vmatmul.mubr.msk.f32.vlgmr.msra.gmra.mrb[0].mxu0 %vm35_vm0, %v18_v7 }
   0xd   :  { %2184 = vmatprep.mubr.msk.f32.mxu0 %vm35_vm0, %v19_v8 }
  0x10   :  { %2185 = vmatmul.mubr.msk.f32.gmra.mrb[2].mxu0 %vm35_vm0, %v20_v9 }
  0xdf   :  { %v2183_v11 = vpop.f32.mrb[0].mxu0 }
  0xe0   :  { %v114_v12 = vpop.f32.mrb[1].mxu0  ;;  %v2795_v13 = vadd.f32 %v2183_v11, %v1982_v10 }
  0xe1   :  { %v2797_v14 = vadd.f32 %v1982_v10, %v114_v12 }
  0xe2   :  { %v153_v21 = vmul.f32 %v2795_v13, %v2795_v13  ;;  %v139_v22 = vsel %vm135_vm1, %v2795_v13, 0.0 }
  0xe3   :  { %v136_v15 = vsel %vm135_vm1, %v2797_v14, 0.0  ;;  %v152_v16 = vmul.f32 %v2797_v14, %v2797_v14  ;;  %v2186_v17 = vpop.f32.mrb[2].mxu0 }
  0xe4   :  { %137 = vadd.xlane.f32.xlu0 %v136_v15  ;;  %v124_v18 = vpop.f32.mrb[3].mxu0  ;;  %v2810_v23 = vadd.f32 %v2186_v17, %v1982_v10  ;;  %v159_v24 = vsel %vm135_vm1, %v153_v21, 0.0 }
  0xe5   :  { %v156_v19 = vsel %vm135_vm1, %v152_v16, 0.0  ;;  %v2804_v20 = vadd.f32 %v1982_v10, %v124_v18 }
  0xe6   :  { %157 = vadd.xlane.f32.xlu1 %v156_v19  ;;  %v145_v27 = vsel %vm135_vm1, %v2810_v23, 0.0  ;;  %v155_v28 = vmul.f32 %v2810_v23, %v2810_v23 }
  0xe7   :  { %v142_v25 = vsel %vm135_vm1, %v2804_v20, 0.0  ;;  %v154_v26 = vmul.f32 %v2804_v20, %v2804_v20 }
  0xe8   :  { %140 = vadd.xlane.f32.xlu0 %v139_v22  ;;  %v165_v30 = vsel %vm135_vm1, %v155_v28, 0.0 }
  0xe9   :  { %v162_v29 = vsel %vm135_vm1, %v154_v26, 0.0 }
  0xea   :  { %160 = vadd.xlane.f32.xlu1 %v159_v24 }
  0xec   :  { %143 = vadd.xlane.f32.xlu0 %v142_v25 }
  0xee   :  { %146 = vadd.xlane.f32.xlu1 %v145_v27 }
  0xf0   :  { %163 = vadd.xlane.f32.xlu0 %v162_v29 }
  0xf2   :  { %166 = vadd.xlane.f32.xlu1 %v165_v30 }
 0x171   :  { %v138_v34 = vpop.xlane.xlu0 %137 }
 0x172   :  { %v148_v35 = vmul.f32 0.0625, %v138_v34 }
 0x173   :  { %v158_v36 = vpop.xlane.xlu1 %157 }
 0x174   :  { %v172_v37 = vmul.f32 %v148_v35, %v148_v35  ;;  %v168_v38 = vmul.f32 0.0625, %v158_v36  ;;  %v184_v1 = vsub.f32 %v2797_v14, %v148_v35 }
 0x175   :  { %v141_v39 = vpop.xlane.xlu0 %140 }
 0x176   :  { %v176_v40 = vsub.f32 %v168_v38, %v172_v37  ;;  %v149_v41 = vmul.f32 0.0625, %v141_v39 }
 0x177   :  { %v161_v42 = vpop.xlane.xlu1 %160 }
 0x178   :  { %v180_v43 = vmax.f32 %v176_v40, 0.0  ;;  %v173_v44 = vmul.f32 %v149_v41, %v149_v41  ;;  %v169_v45 = vmul.f32 0.0625, %v161_v42  ;;  %v185_v7 = vsub.f32 %v2795_v13, %v149_v41 }
 0x179   :  { %v144_v46 = vpop.xlane.xlu0 %143 }
 0x17a   :  { %v188_v47 = vadd.f32 1e-05, %v180_v43  ;;  %v177_v48 = vsub.f32 %v169_v45, %v173_v44  ;;  %v150_v49 = vmul.f32 0.0625, %v144_v46 }
 0x17b   :  { %v147_v50 = vpop.xlane.xlu1 %146 }
 0x17c   :  { %2659 = vrsqrt.f32 %v188_v47  ;;  %v181_v51 = vmax.f32 %v177_v48, 0.0  ;;  %v151_v52 = vmul.f32 0.0625, %v147_v50  ;;  %v174_v55 = vmul.f32 %v150_v49, %v150_v49 }
 0x17d   :  { %v164_v53 = vpop.xlane.xlu0 %163  ;;  %v186_v15 = vsub.f32 %v2804_v20, %v150_v49 }
 0x17e   :  { %v189_v54 = vadd.f32 1e-05, %v181_v51  ;;  %v170_v56 = vmul.f32 0.0625, %v164_v53  ;;  %v175_v58 = vmul.f32 %v151_v52, %v151_v52  ;;  %v187_v19 = vsub.f32 %v2810_v23, %v151_v52  ;;  %v430_v53 = vld [vmem:[%s3323_s2 + $0x30] sm:$0xff] }
 0x17f   :  { %v167_v57 = vpop.xlane.xlu1 %166 }
 0x180   :  { %2661 = vrsqrt.f32 %v189_v54  ;;  %v178_v59 = vsub.f32 %v170_v56, %v174_v55  ;;  %v171_v60 = vmul.f32 0.0625, %v167_v57  ;;  %v431_v54 = vld [vmem:[%s3323_s2 + $0x38] sm:$0xff]  ;;  %v432_v56 = vld [vmem:[%s3323_s2 + $0x40] sm:$0xff]  ;;  %v433_v57 = vld [vmem:[%s3323_s2 + $0x48] sm:$0xff] }
 0x181   :  { %v2411_v55 = vpack.c.bf16 %v431_v54, %v430_v53  ;;  %v22_v53 = vld [vmem:[%s3324_s0 + $0x28] sm:$0xff] }
 0x182   :  { %v182_v61 = vmax.f32 %v178_v59, 0.0  ;;  %v179_v62 = vsub.f32 %v171_v60, %v175_v58  ;;  %v2415_v58 = vpack.c.bf16 %v433_v57, %v432_v56  ;;  %v2889_v59 = vld [vmem:[%s3325_s3 + $0x11] ss:$0 sm:$0xff]  ;;  %v2896_v60 = vld [vmem:[%s3325_s3 + $0x10] ss:$0 sm:$0xff] }
 0x183   :  { %2412 = vmatprep.subr.bf16.mxu1 %v2411_v55 }
 0x184   :  { %v190_v63 = vadd.f32 1e-05, %v182_v61  ;;  %v183_v0 = vmax.f32 %v179_v62, 0.0  ;;  %v2901_v61 = vld [vmem:[%s3325_s3 + $0x12] ss:$0 sm:$0xff] }
 0x185   :  { %v2910_v62 = vld [vmem:[%s3325_s3 + $0x13] ss:$0 sm:$0xff] }
 0x186   :  { %v2660_v2 = vpop.eup %2659  ;;  %2663 = vrsqrt.f32 %v190_v63  ;;  %v191_v3 = vadd.f32 1e-05, %v183_v0 }
 0x187   :  { %v196_v5 = vmul.f32 %v2660_v2, %v184_v1 }
 0x188   :  { %2665 = vrsqrt.f32 %v191_v3 }
 0x189   :  { %v204_v8 = vmul.f32 %v1987_v4, %v196_v5 }
 0x18a   :  { %v2662_v9 = vpop.eup %2661 }
 0x18b   :  { %v212_v10 = vadd.f32 %v1988_v6, %v204_v8  ;;  %v197_v11 = vmul.f32 %v2662_v9, %v185_v7 }
 0x18d   :  { %vm216_vm2 = vcmp.ge.f32.partialorder %v212_v10, 0.0  ;;  %v220_v12 = vmul.f32 0.01, %v212_v10  ;;  %v205_v14 = vmul.f32 %v1987_v4, %v197_v11 }
 0x18f   :  { %v224_v16 = vsel %vm216_vm2, %v212_v10, %v220_v12  ;;  %v213_v17 = vadd.f32 %v1988_v6, %v205_v14 }
 0x190   :  { %v2664_v18 = vpop.eup %2663  ;;  %2191 = vmatprep.mubr.msk.f32.mxu1 %vm135_vm1, %v224_v16 }
 0x191   :  { %vm217_vm3 = vcmp.ge.f32.partialorder %v213_v17, 0.0  ;;  %v221_v21 = vmul.f32 0.01, %v213_v17  ;;  %v198_v22 = vmul.f32 %v2664_v18, %v186_v15 }
 0x192   :  { %v2666_v13 = vpop.eup %2665 }
 0x193   :  { %v225_v24 = vsel %vm217_vm3, %v213_v17, %v221_v21  ;;  %v206_v25 = vmul.f32 %v1987_v4, %v198_v22  ;;  %v199_v26 = vmul.f32 %v2666_v13, %v187_v19 }
 0x194   :  { %2192 = vmatmul.mubr.msk.f32.vlgmr.msra.gmra.mrb[0].mxu1 %vm135_vm1, %v225_v24 }
 0x195   :  { %v214_v27 = vadd.f32 %v1988_v6, %v206_v25  ;;  %v207_v28 = vmul.f32 %v1987_v4, %v199_v26  ;;  %2414 = vmatpush3.bf16.msra.mxu1 %v2411_v55 }
 0x196   :  { %2416 = vmatprep.subr.bf16.mxu1 %v2415_v58 }
 0x197   :  { %vm218_vm4 = vcmp.ge.f32.partialorder %v214_v27, 0.0  ;;  %v222_v20 = vmul.f32 0.01, %v214_v27  ;;  %v215_v29 = vadd.f32 %v1988_v6, %v207_v28 }
 0x199   :  { %v226_v30 = vsel %vm218_vm4, %v214_v27, %v222_v20  ;;  %vm219_vm5 = vcmp.ge.f32.partialorder %v215_v29, 0.0  ;;  %v223_v31 = vmul.f32 0.01, %v215_v29  ;;  %2418 = vmatpush3.bf16.msra.mxu1 %v2415_v58 }
 0x19a   :  { %2194 = vmatprep.mubr.msk.f32.mxu1 %vm135_vm1, %v226_v30 }
 0x19b   :  { %v227_v23 = vsel %vm219_vm5, %v215_v29, %v223_v31 }
 0x19c   :  { %2195 = vmatmul.mubr.msk.f32.gmra.mrb[2].mxu1 %vm135_vm1, %v227_v23  ;;  %vm1740_vm1 = vcmask 257024  }
 0x267   :  { %v2193_v33 = vpop.f32.mrb[0].mxu1 }
 0x268   :  { %v2846_v34 = vadd.f32 %v2193_v33, %v1989_v32  ;;  %v313_v35 = vpop.f32.mrb[1].mxu1 }
 0x269   :  { %v2848_v36 = vadd.f32 %v1989_v32, %v313_v35  ;;  %v1994_v35 = vld [vmem:[%s3325_s3 + $0x4] ss:$0 sm:$0xff] }
 0x26a   :  { %v337_v37 = vsel %vm35_vm0, %v2846_v34, 0.0  ;;  %v351_v38 = vmul.f32 %v2846_v34, %v2846_v34 }
 0x26b   :  { %338 = vadd.xlane.f32.xlu1 %v337_v37  ;;  %v334_v39 = vsel %vm35_vm0, %v2848_v36, 0.0  ;;  %v350_v40 = vmul.f32 %v2848_v36, %v2848_v36 }
 0x26c   :  { %335 = vadd.xlane.f32.xlu0 %v334_v39  ;;  %v357_v41 = vsel %vm35_vm0, %v351_v38, 0.0 }
 0x26d   :  { %v354_v43 = vsel %vm35_vm0, %v350_v40, 0.0  ;;  %v1995_v40 = vld [vmem:[%s3325_s3 + $0x5] ss:$0 sm:$0xff] }
 0x26f   :  { %358 = vadd.xlane.f32.xlu1 %v357_v41  ;;  %v2196_v42 = vpop.f32.mrb[2].mxu1 }
 0x270   :  { %v2860_v44 = vadd.f32 %v2196_v42, %v1989_v32  ;;  %355 = vadd.xlane.f32.xlu0 %v354_v43  ;;  %v323_v45 = vpop.f32.mrb[3].mxu1 }
 0x271   :  { %v2862_v46 = vadd.f32 %v1989_v32, %v323_v45 }
 0x272   :  { %v343_v47 = vsel %vm35_vm0, %v2860_v44, 0.0  ;;  %v353_v48 = vmul.f32 %v2860_v44, %v2860_v44 }
 0x273   :  { %344 = vadd.xlane.f32.xlu1 %v343_v47  ;;  %v340_v49 = vsel %vm35_vm0, %v2862_v46, 0.0  ;;  %v352_v50 = vmul.f32 %v2862_v46, %v2862_v46 }
 0x274   :  { %341 = vadd.xlane.f32.xlu0 %v340_v49  ;;  %v363_v51 = vsel %vm35_vm0, %v353_v48, 0.0  ;;  %v21_v49 = vld [vmem:[%s3324_s0 + $0x20] sm:$0xff] }
 0x275   :  { %v360_v52 = vsel %vm35_vm0, %v352_v50, 0.0 }
 0x277   :  { %364 = vadd.xlane.f32.xlu1 %v363_v51 }
 0x278   :  { %361 = vadd.xlane.f32.xlu0 %v360_v52 }
 0x288   :  { %555 = vrot.lane.b32.xlu1 %v2889_v59, %s2731_s27 }
 0x28c   :  { %568 = vrot.lane.b32.xlu1 %v2901_v61, %s2731_s27 }
 0x28e   :  { %542 = vrot.lane.b32.xlu0 %v2896_v60, %s2731_s27 }
 0x290   :  { %581 = vrot.lane.b32.xlu1 %v2910_v62, %s2731_s27 }
 0x2f8   :  { %v339_v63 = vpop.xlane.xlu1 %338 }
 0x2f9   :  { %v347_v0 = vmul.f32 0.035714287, %v339_v63  ;;  %v336_v1 = vpop.xlane.xlu0 %335 }
 0x2fa   :  { %v346_v2 = vmul.f32 0.035714287, %v336_v1 }
 0x2fb   :  { %v371_v4 = vmul.f32 %v347_v0, %v347_v0  ;;  %v383_v23 = vsub.f32 %v2846_v34, %v347_v0 }
 0x2fc   :  { %v359_v3 = vpop.xlane.xlu1 %358  ;;  %v370_v7 = vmul.f32 %v346_v2, %v346_v2  ;;  %v382_v33 = vsub.f32 %v2848_v36, %v346_v2  ;;  %v23_v2 = vld [vmem:[%s3324_s0 + $0x30] sm:$0xff] }
 0x2fd   :  { %v367_v5 = vmul.f32 0.035714287, %v359_v3  ;;  %v356_v6 = vpop.xlane.xlu0 %355 }
 0x2fe   :  { %v366_v8 = vmul.f32 0.035714287, %v356_v6 }
 0x2ff   :  { %v375_v9 = vsub.f32 %v367_v5, %v371_v4  ;;  %v24_v4 = vld [vmem:[%s3324_s0 + $0x38] sm:$0xff] }
 0x300   :  { %v374_v10 = vsub.f32 %v366_v8, %v370_v7  ;;  %v345_v11 = vpop.xlane.xlu1 %344 }
 0x301   :  { %v379_v12 = vmax.f32 %v375_v9, 0.0  ;;  %v349_v14 = vmul.f32 0.035714287, %v345_v11  ;;  %v342_v15 = vpop.xlane.xlu0 %341 }
 0x302   :  { %v378_v16 = vmax.f32 %v374_v10, 0.0  ;;  %v348_v17 = vmul.f32 0.035714287, %v342_v15  ;;  %v1996_v10 = vld [vmem:[%s3325_s3 + $0x6] ss:$0 sm:$0xff] }
 0x303   :  { %v387_v18 = vadd.f32 1e-05, %v379_v12  ;;  %v373_v22 = vmul.f32 %v349_v14, %v349_v14  ;;  %v385_v34 = vsub.f32 %v2860_v44, %v349_v14 }
 0x304   :  { %v386_v19 = vadd.f32 1e-05, %v378_v16  ;;  %v365_v21 = vpop.xlane.xlu1 %364  ;;  %v372_v25 = vmul.f32 %v348_v17, %v348_v17  ;;  %v384_v48 = vsub.f32 %v2862_v46, %v348_v17 }
 0x305   :  { %2667 = vrsqrt.f32 %v387_v18  ;;  %v369_v13 = vmul.f32 0.035714287, %v365_v21  ;;  %v362_v24 = vpop.xlane.xlu0 %361 }
 0x306   :  { %2669 = vrsqrt.f32 %v386_v19  ;;  %v368_v26 = vmul.f32 0.035714287, %v362_v24 }
 0x307   :  { %v377_v27 = vsub.f32 %v369_v13, %v373_v22 }
 0x308   :  { %v376_v28 = vsub.f32 %v368_v26, %v372_v25  ;;  %v556_v9 = vpop.permute.xlu1 %555 }
 0x309   :  { %v381_v20 = vmax.f32 %v377_v27, 0.0  ;;  %v543_v12 = vpop.permute.xlu0 %542 }
 0x30a   :  { %v380_v29 = vmax.f32 %v376_v28, 0.0 }
 0x30b   :  { %v389_v30 = vadd.f32 1e-05, %v381_v20 }
 0x30c   :  { %v388_v31 = vadd.f32 1e-05, %v380_v29  ;;  %v569_v18 = vpop.permute.xlu1 %568 }
 0x30d   :  { %2671 = vrsqrt.f32 %v389_v30 }
 0x30e   :  { %2673 = vrsqrt.f32 %v388_v31 }
 0x30f   :  { %v2668_v32 = vpop.eup %2667 }
 0x310   :  { %v2670_v37 = vpop.eup %2669  ;;  %v395_v38 = vmul.f32 %v2668_v32, %v383_v23  ;;  %v582_v27 = vpop.permute.xlu1 %581 }
 0x311   :  { %v394_v39 = vmul.f32 %v2670_v37, %v382_v33 }
 0x312   :  { %v403_v41 = vmul.f32 %v1994_v35, %v395_v38 }
 0x313   :  { %v402_v42 = vmul.f32 %v1994_v35, %v394_v39 }
 0x314   :  { %v411_v43 = vadd.f32 %v1995_v40, %v403_v41 }
 0x315   :  { %v410_v45 = vadd.f32 %v1995_v40, %v402_v42 }
 0x316   :  { %vm415_vm6 = vcmp.ge.f32.partialorder %v411_v43, 0.0  ;;  %v419_v47 = vmul.f32 0.01, %v411_v43 }
 0x317   :  { %v2672_v36 = vpop.eup %2671  ;;  %vm414_vm7 = vcmp.ge.f32.partialorder %v410_v45, 0.0  ;;  %v418_v50 = vmul.f32 0.01, %v410_v45 }
 0x318   :  { %v2674_v51 = vpop.eup %2673  ;;  %v397_v52 = vmul.f32 %v2672_v36, %v385_v34  ;;  %v423_v54 = vsel %vm415_vm6, %v411_v43, %v419_v47  ;;  %vm1969_vm6 = vcmask 523264  }
 0x319   :  { %v396_v55 = vmul.f32 %v2674_v51, %v384_v48  ;;  %v422_v44 = vsel %vm414_vm7, %v410_v45, %v418_v50  ;;  %v2932_v58 = vadd.f32 %v423_v54, %v22_v53  ;;  %v799_v51 = vld [vmem:[%s3326_s1 + $0x10] sm:$0xff]  ;;  %vm1774_vm7 = vcmask 31744  }
 0x31a   :  { %v2930_v56 = vadd.f32 %v422_v44, %v21_v49  ;;  %v405_v57 = vmul.f32 %v1994_v35, %v397_v52 }
 0x31b   :  { %v404_v46 = vmul.f32 %v1994_v35, %v396_v55 }
 0x31c   :  { %2205 = vmatprep.mubr.msk.f32.mxu1 %vm35_vm0, %v2930_v56  ;;  %v413_v63 = vadd.f32 %v1995_v40, %v405_v57 }
 0x31d   :  { %2206 = vmatmul.mubr.msk.f32.vlgmr.msra.gmra.mrb[4].mxu1 %vm35_vm0, %v2932_v58  ;;  %v412_v0 = vadd.f32 %v1995_v40, %v404_v46 }
 0x31e   :  { %vm417_vm8 = vcmp.ge.f32.partialorder %v413_v63, 0.0  ;;  %v421_v1 = vmul.f32 0.01, %v413_v63 }
 0x31f   :  { %vm416_vm9 = vcmp.ge.f32.partialorder %v412_v0, 0.0  ;;  %v420_v3 = vmul.f32 0.01, %v412_v0 }
 0x320   :  { %v425_v5 = vsel %vm417_vm8, %v413_v63, %v421_v1  ;;  %vm1926_vm8 = vcmask 517120  }
 0x321   :  { %v424_v6 = vsel %vm416_vm9, %v412_v0, %v420_v3  ;;  %v2946_v8 = vadd.f32 %v425_v5, %v24_v4 }
 0x322   :  { %v2944_v7 = vadd.f32 %v424_v6, %v23_v2 }
 0x324   :  { %2208 = vmatprep.mubr.msk.f32.mxu1 %vm35_vm0, %v2944_v7 }
 0x325   :  { %2209 = vmatmul.mubr.msk.f32.gmra.mrb[6].mxu1 %vm35_vm0, %v2946_v8 }
 0x3f0   :  { %v2207_v11 = vpop.f32.mrb[4].mxu1 }
 0x3f1   :  { %v2955_v14 = vadd.f32 %v2207_v11, %v1996_v10  ;;  %v517_v15 = vpop.f32.mrb[5].mxu1 }
 0x3f2   :  { %v2957_v16 = vadd.f32 %v1996_v10, %v517_v15 }
 0x3f3   :  { %v546_v17 = vmul.f32 %v543_v12, %v2955_v14  ;;  %v559_v13 = vmul.f32 %v556_v9, %v2955_v14  ;;  %v572_v30 = vmul.f32 %v569_v18, %v2955_v14  ;;  %v585_v33 = vmul.f32 %v582_v27, %v2955_v14 }
 0x3f4   :  { %v545_v19 = vmul.f32 %v543_v12, %v2957_v16  ;;  %2243 = vmatprep.mubr.msk.f32.mxu0 %vm35_vm0, %v2957_v16  ;;  %v558_v22 = vmul.f32 %v556_v9, %v2957_v16  ;;  %v571_v29 = vmul.f32 %v569_v18, %v2957_v16  ;;  %v584_v32 = vmul.f32 %v582_v27, %v2957_v16 }
 0x3f6   :  { %v2577_v21 = vpack.i.bf16 %v546_v17, %v545_v19  ;;  %v2587_v20 = vpack.i.bf16 %v559_v13, %v558_v22  ;;  %v2597_v37 = vpack.i.bf16 %v572_v30, %v571_v29  ;;  %v2607_v41 = vpack.i.bf16 %v585_v33, %v584_v32  ;;  %v826_v29 = vld [vmem:[%s3325_s3 + $0x28] sm:$0xff]  ;;  %v827_v30 = vld [vmem:[%s3325_s3 + $0x30] sm:$0xff]  ;;  %v829_v33 = vld [vmem:[%s3325_s3 + $0x40] sm:$0xff] }
 0x3f8   :  { %v2210_v24 = vpop.f32.mrb[6].mxu1  ;;  %2578 = vrot.lane.b32.xlu0 %v2577_v21, %s2732_s22 }
 0x3f9   :  { %v2966_v25 = vadd.f32 %v2210_v24, %v1996_v10  ;;  %v527_v26 = vpop.f32.mrb[7].mxu1 }
 0x3fa   :  { %v2968_v28 = vadd.f32 %v1996_v10, %v527_v26 }
 0x3fb   :  { %v548_v31 = vmul.f32 %v543_v12, %v2966_v25  ;;  %v561_v39 = vmul.f32 %v556_v9, %v2966_v25  ;;  %v574_v43 = vmul.f32 %v569_v18, %v2966_v25  ;;  %v587_v47 = vmul.f32 %v582_v27, %v2966_v25 }
 0x3fc   :  { %2588 = vrot.lane.b32.xlu0 %v2587_v20, %s2732_s22  ;;  %v547_v23 = vmul.f32 %v543_v12, %v2968_v28  ;;  %v560_v38 = vmul.f32 %v556_v9, %v2968_v28  ;;  %v573_v42 = vmul.f32 %v569_v18, %v2968_v28  ;;  %v586_v34 = vmul.f32 %v582_v27, %v2968_v28  ;;  %v825_v20 = vld [vmem:[%s3325_s3 + $0x20] sm:$0xff] }
 0x3fe   :  { %v2582_v35 = vpack.i.bf16 %v548_v31, %v547_v23  ;;  %v2592_v40 = vpack.i.bf16 %v561_v39, %v560_v38  ;;  %v2602_v45 = vpack.i.bf16 %v574_v43, %v573_v42  ;;  %v2612_v36 = vpack.i.bf16 %v587_v47, %v586_v34  ;;  %v828_v23 = vld [vmem:[%s3325_s3 + $0x38] sm:$0xff]  ;;  %v831_v38 = vld [vmem:[%s3325_s3 + $0x50] sm:$0xff]  ;;  %v798_v42 = vld [vmem:[%s3326_s1 + $0x8] sm:$0xff] }
 0x3ff   :  { %v2467_v31 = vpack.c.bf16 %v826_v29, %v825_v20  ;;  %v2471_v32 = vpack.c.bf16 %v828_v23, %v827_v30  ;;  %v832_v39 = vld [vmem:[%s3325_s3 + $0x58] sm:$0xff]  ;;  %v797_v34 = vld [vmem:[%s3326_s1] sm:$0xff] }
 0x400   :  { %2583 = vrot.lane.b32.xlu1 %v2582_v35, %s2732_s22  ;;  %2598 = vrot.lane.b32.xlu0 %v2597_v37, %s2732_s22  ;;  %v830_v35 = vld [vmem:[%s3325_s3 + $0x48] sm:$0xff] }
 0x401   :  { %2468 = vmatprep.subr.bf16.mxu1 %v2467_v31  ;;  %v2475_v37 = vpack.c.bf16 %v830_v35, %v829_v33 }
 0x402   :  { %2470 = vmatpush3.bf16.msra.mxu1 %v2467_v31 }
 0x403   :  { %2472 = vmatprep.subr.bf16.mxu1 %v2471_v32 }
 0x404   :  { %2593 = vrot.lane.b32.xlu1 %v2592_v40, %s2732_s22  ;;  %2608 = vrot.lane.b32.xlu0 %v2607_v41, %s2732_s22  ;;  %v2479_v40 = vpack.c.bf16 %v832_v39, %v831_v38 }
 0x406   :  { %2474 = vmatpush3.bf16.msra.mxu1 %v2471_v32 }
 0x407   :  { %2476 = vmatprep.subr.bf16.mxu1 %v2475_v37 }
 0x408   :  { %2603 = vrot.lane.b32.xlu1 %v2602_v45, %s2732_s22 }
 0x40a   :  { %2478 = vmatpush3.bf16.msra.mxu1 %v2475_v37 }
 0x40b   :  { %2480 = vmatprep.subr.bf16.mxu1 %v2479_v40 }
 0x40c   :  { %2613 = vrot.lane.b32.xlu1 %v2612_v36, %s2732_s22 }
 0x40e   :  { %2482 = vmatpush3.bf16.msra.mxu1 %v2479_v40 }
 0x46a   :  { %v2579_v48 = vpop.permute.xlu0 %2578 }
 0x46b   :  { %v2581_v49 = vunpack.i.h.bf16 %v2579_v48  ;;  %v2580_v50 = vunpack.i.l.bf16 %v2579_v48 }
 0x46d   :  { %v2419_v52 = vpack.c.bf16 %v2581_v49, %v2580_v50 }
 0x46e   :  { %v2589_v53 = vpop.permute.xlu0 %2588 }
 0x46f   :  { %2421 = vmatprep.subr.msk.bf16.mxu0 %vm2991_vm10, %v2419_v52  ;;  %v2591_v55 = vunpack.i.h.bf16 %v2589_v53  ;;  %v2590_v44 = vunpack.i.l.bf16 %v2589_v53 }
 0x470   :  { %2424 = vmatpush3.bf16.xpose.msk.msra.mxu0 %vm2991_vm10, %v2419_v52 }
 0x471   :  { %v2431_v0 = vpack.c.bf16 %v2591_v55, %v2590_v44  ;;  %v800_v55 = vld [vmem:[%s3326_s1 + $0x18] sm:$0xff] }
 0x472   :  { %v2584_v54 = vpop.permute.xlu1 %2583  ;;  %v2599_v5 = vpop.permute.xlu0 %2598 }
 0x473   :  { %v2586_v57 = vunpack.i.h.bf16 %v2584_v54  ;;  %v2585_v46 = vunpack.i.l.bf16 %v2584_v54  ;;  %v2601_v6 = vunpack.i.h.bf16 %v2599_v5  ;;  %v2600_v9 = vunpack.i.l.bf16 %v2599_v5  ;;  %v839_v5 = vld [vmem:[%s3325_s3 + $0x90] sm:$0xff] }
 0x475   :  { %v2425_v63 = vpack.c.bf16 %v2586_v57, %v2585_v46  ;;  %v2443_v10 = vpack.c.bf16 %v2601_v6, %v2600_v9  ;;  %v833_v57 = vld [vmem:[%s3325_s3 + $0x60] sm:$0xff]  ;;  %v834_v46 = vld [vmem:[%s3325_s3 + $0x68] sm:$0xff] }
 0x476   :  { %v2594_v1 = vpop.permute.xlu1 %2593  ;;  %v2609_v18 = vpop.permute.xlu0 %2608 }
 0x477   :  { %2427 = vmatprep.subr.msk.bf16.mxu0 %vm2991_vm10, %v2425_v63  ;;  %v2596_v2 = vunpack.i.h.bf16 %v2594_v1  ;;  %v2595_v3 = vunpack.i.l.bf16 %v2594_v1  ;;  %v2611_v19 = vunpack.i.h.bf16 %v2609_v18  ;;  %v2610_v21 = vunpack.i.l.bf16 %v2609_v18  ;;  %v836_v1 = vld [vmem:[%s3325_s3 + $0x78] sm:$0xff] }
 0x478   :  { %2430 = vmatpush3.bf16.xpose.msk.msra.mxu0 %vm2991_vm10, %v2425_v63  ;;  %v2483_v63 = vpack.c.bf16 %v834_v46, %v833_v57  ;;  %v1086_v57 = vld [vmem:[%s3323_s2 + $0x68] sm:$0xff] }
 0x479   :  { %2433 = vmatprep.subr.msk.bf16.mxu0 %vm2991_vm10, %v2431_v0  ;;  %v2437_v4 = vpack.c.bf16 %v2596_v2, %v2595_v3  ;;  %v2455_v22 = vpack.c.bf16 %v2611_v19, %v2610_v21  ;;  %v837_v3 = vld [vmem:[%s3325_s3 + $0x80] sm:$0xff] }
 0x47a   :  { %v2604_v11 = vpop.permute.xlu1 %2603  ;;  %2484 = vmatprep.subr.bf16.mxu1 %v2483_v63 }
 0x47b   :  { %v2606_v12 = vunpack.i.h.bf16 %v2604_v11  ;;  %v2605_v15 = vunpack.i.l.bf16 %v2604_v11  ;;  %2486 = vmatpush3.bf16.msra.mxu1 %v2483_v63 }
 0x47d   :  { %v2449_v17 = vpack.c.bf16 %v2606_v12, %v2605_v15 }
 0x47e   :  { %v2614_v13 = vpop.permute.xlu1 %2613 }
 0x47f   :  { %v2616_v24 = vunpack.i.h.bf16 %v2614_v13  ;;  %v2615_v26 = vunpack.i.l.bf16 %v2614_v13 }
 0x480   :  { %2436 = vmatpush3.bf16.xpose.msk.msra.mxu0 %vm2991_vm10, %v2431_v0  ;;  %v835_v0 = vld [vmem:[%s3325_s3 + $0x70] sm:$0xff] }
 0x481   :  { %2439 = vmatprep.subr.msk.bf16.mxu0 %vm2991_vm10, %v2437_v4  ;;  %v2461_v27 = vpack.c.bf16 %v2616_v24, %v2615_v26  ;;  %v2487_v2 = vpack.c.bf16 %v836_v1, %v835_v0 }
 0x483   :  { %2488 = vmatprep.subr.bf16.mxu1 %v2487_v2 }
 0x484   :  { %2490 = vmatpush3.bf16.msra.mxu1 %v2487_v2 }
 0x488   :  { %2442 = vmatpush3.bf16.xpose.msk.msra.mxu0 %vm2991_vm10, %v2437_v4 }
 0x489   :  { %2445 = vmatprep.subr.msk.bf16.mxu0 %vm2991_vm10, %v2443_v10 }
 0x490   :  { %2448 = vmatpush3.bf16.xpose.msk.msra.mxu0 %vm2991_vm10, %v2443_v10 }
 0x491   :  { %2451 = vmatprep.subr.msk.bf16.mxu0 %vm2991_vm10, %v2449_v17 }
 0x498   :  { %2454 = vmatpush3.bf16.xpose.msk.msra.mxu0 %vm2991_vm10, %v2449_v17 }
 0x499   :  { %2457 = vmatprep.subr.msk.bf16.mxu0 %vm2991_vm10, %v2455_v22 }
 0x4a0   :  { %2460 = vmatpush3.bf16.xpose.msk.msra.mxu0 %vm2991_vm10, %v2455_v22 }
 0x4a1   :  { %2463 = vmatprep.subr.msk.bf16.mxu0 %vm2991_vm10, %v2461_v27 }
 0x4a8   :  { %2466 = vmatpush3.bf16.xpose.msk.msra.mxu0 %vm2991_vm10, %v2461_v27 }
 0x4af   :  { %2244 = vmatmul.mubr.msk.f32.vlgmr.msra.gmra.mrb[4].mxu0 %vm35_vm0, %v2955_v14 }
 0x4b0   :  { %2246 = vmatprep.mubr.msk.f32.mxu0 %vm35_vm0, %v2968_v28 }
 0x4b3   :  { %2247 = vmatmul.mubr.msk.f32.gmra.mrb[6].mxu0 %vm35_vm0, %v2966_v25 }
 0x582   :  { %v2245_v41 = vpop.f32.mrb[4].mxu0 }
 0x583   :  { %v794_v43 = vmul.f32 0.35355338, %v2245_v41  ;;  %v774_v45 = vpop.f32.mrb[5].mxu0 }
 0x584   :  { %v793_v47 = vmul.f32 0.35355338, %v774_v45 }
 0x585   :  { %v802_v36 = vadd.f32 %v798_v42, %v794_v43 }
 0x586   :  { %v2248_v48 = vpop.f32.mrb[6].mxu0  ;;  %v801_v49 = vadd.f32 %v797_v34, %v793_v47 }
 0x587   :  { %807 = vmax.xlane.f32.xlu1 %v802_v36  ;;  %v784_v50 = vpop.f32.mrb[7].mxu0  ;;  %v796_v53 = vmul.f32 0.35355338, %v2248_v48 }
 0x588   :  { %v795_v52 = vmul.f32 0.35355338, %v784_v50  ;;  %805 = vmax.xlane.f32.xlu0 %v801_v49 }
 0x589   :  { %v804_v44 = vadd.f32 %v800_v55, %v796_v53 }
 0x58a   :  { %v803_v54 = vadd.f32 %v799_v51, %v795_v52 }
 0x58c   :  { %809 = vmax.xlane.f32.xlu0 %v803_v54 }
 0x590   :  { %811 = vmax.xlane.f32.xlu0 %v804_v44 }
 0x598   :  { %595 = vrot.lane.b32.xlu1 %v2889_v59, %s2733_s26  ;;  %v838_v59 = vld [vmem:[%s3325_s3 + $0x88] sm:$0xff] }
 0x599   :  { %v2491_v4 = vpack.c.bf16 %v838_v59, %v837_v3 }
 0x59b   :  { %2492 = vmatprep.subr.bf16.mxu1 %v2491_v4 }
 0x59c   :  { %602 = vrot.lane.b32.xlu1 %v2901_v61, %s2733_s26  ;;  %2494 = vmatpush3.bf16.msra.mxu1 %v2491_v4  ;;  %v840_v61 = vld [vmem:[%s3325_s3 + $0x98] sm:$0xff] }
 0x59d   :  { %v2495_v6 = vpack.c.bf16 %v840_v61, %v839_v5 }
 0x59f   :  { %2496 = vmatprep.subr.bf16.mxu1 %v2495_v6 }
 0x5a0   :  { %609 = vrot.lane.b32.xlu1 %v2910_v62, %s2733_s26  ;;  %2498 = vmatpush3.bf16.msra.mxu1 %v2495_v6 }
 0x5a6   :  { %588 = vrot.lane.b32.xlu0 %v2896_v60, %s2733_s26 }
 0x614   :  { %v808_v9 = vpop.xlane.xlu1 %807 }
 0x615   :  { %v814_v10 = vsub.f32 %v802_v36, %v808_v9  ;;  %v806_v11 = vpop.xlane.xlu0 %805 }
 0x616   :  { %v813_v12 = vsub.f32 %v801_v49, %v806_v11 }
 0x617   :  { %v819_v62 = vmul.f32 1.442695, %v814_v10 }
 0x618   :  { %v817_v15 = vmul.f32 1.442695, %v813_v12  ;;  %v596_v21 = vpop.permute.xlu1 %595 }
 0x619   :  { %v810_v17 = vpop.xlane.xlu0 %809  ;;  %v598_v23 = vmul.f32 %v596_v21, %v2957_v16  ;;  %v599_v32 = vmul.f32 %v596_v21, %v2955_v14  ;;  %v600_v37 = vmul.f32 %v596_v21, %v2968_v28  ;;  %v601_v38 = vmul.f32 %v596_v21, %v2966_v25 }
 0x61a   :  { %2675 = vpow2.f32 %v817_v15  ;;  %v815_v18 = vsub.f32 %v803_v54, %v810_v17 }
 0x61b   :  { %2677 = vpow2.f32 %v819_v62  ;;  %v2627_v43 = vpack.i.bf16 %v599_v32, %v598_v23  ;;  %v2632_v36 = vpack.i.bf16 %v601_v38, %v600_v37 }
 0x61c   :  { %v821_v19 = vmul.f32 1.442695, %v815_v18  ;;  %v603_v29 = vpop.permute.xlu1 %602 }
 0x61d   :  { %v812_v22 = vpop.xlane.xlu0 %811  ;;  %v605_v41 = vmul.f32 %v603_v29, %v2957_v16  ;;  %v606_v42 = vmul.f32 %v603_v29, %v2955_v14  ;;  %v607_v45 = vmul.f32 %v603_v29, %v2968_v28  ;;  %v608_v34 = vmul.f32 %v603_v29, %v2966_v25 }
 0x61e   :  { %2679 = vpow2.f32 %v821_v19  ;;  %v816_v13 = vsub.f32 %v804_v44, %v812_v22 }
 0x61f   :  { %v2637_v51 = vpack.i.bf16 %v606_v42, %v605_v41  ;;  %v2642_v54 = vpack.i.bf16 %v608_v34, %v607_v45 }
 0x620   :  { %v823_v24 = vmul.f32 1.442695, %v816_v13  ;;  %v610_v47 = vpop.permute.xlu1 %609 }
 0x621   :  { %v589_v26 = vpop.permute.xlu0 %588  ;;  %v612_v49 = vmul.f32 %v610_v47, %v2957_v16  ;;  %v613_v50 = vmul.f32 %v610_v47, %v2955_v14  ;;  %v614_v52 = vmul.f32 %v610_v47, %v2968_v28  ;;  %v615_v53 = vmul.f32 %v610_v47, %v2966_v25 }
 0x622   :  { %2681 = vpow2.f32 %v823_v24  ;;  %v591_v60 = vmul.f32 %v589_v26, %v2957_v16  ;;  %v592_v27 = vmul.f32 %v589_v26, %v2955_v14  ;;  %v593_v20 = vmul.f32 %v589_v26, %v2968_v28  ;;  %v1083_v14 = vld [vmem:[%s3323_s2 + $0x50] sm:$0xff]  ;;  %v1084_v16 = vld [vmem:[%s3323_s2 + $0x58] sm:$0xff] }
 0x623   :  { %v594_v30 = vmul.f32 %v589_v26, %v2966_v25  ;;  %v2647_v55 = vpack.i.bf16 %v613_v50, %v612_v49  ;;  %v2652_v44 = vpack.i.bf16 %v615_v53, %v614_v52  ;;  %v1085_v25 = vld [vmem:[%s3323_s2 + $0x60] sm:$0xff]  ;;  %v2531_v28 = vpack.c.bf16 %v1084_v16, %v1083_v14 }
 0x624   :  { %v3105_v31 = vpop.eup %2675  ;;  %v2617_v33 = vpack.i.bf16 %v592_v27, %v591_v60  ;;  %v2535_v46 = vpack.c.bf16 %v1086_v57, %v1085_v25 }
 0x625   :  { %v3109_v35 = vpop.eup %2677  ;;  %2281 = vmatprep.mubr.f32.mxu1 %v3105_v31  ;;  %v2622_v39 = vpack.i.bf16 %v594_v30, %v593_v20  ;;  %2532 = vmatprep.subr.bf16.mxu0 %v2531_v28 }
 0x626   :  { %2282 = vmatmul.mubr.f32.vlgmr.msra.gmra.mrb[8].mxu1 %v3109_v35  ;;  %2618 = vrot.lane.b32.xlu0 %v2617_v33, %s2733_s26 }
 0x627   :  { %2623 = vrot.lane.b32.xlu1 %v2622_v39, %s2733_s26  ;;  %2534 = vmatpush3.bf16.msra.mxu0 %v2531_v28 }
 0x628   :  { %v3117_v40 = vpop.eup %2679  ;;  %2536 = vmatprep.subr.bf16.mxu0 %v2535_v46 }
 0x629   :  { %2284 = vmatprep.mubr.f32.mxu1 %v3117_v40 }
 0x62a   :  { %2628 = vrot.lane.b32.xlu0 %v2627_v43, %s2733_s26 }
 0x62b   :  { %2633 = vrot.lane.b32.xlu1 %v2632_v36, %s2733_s26  ;;  %2538 = vmatpush3.bf16.msra.mxu0 %v2535_v46 }
 0x62c   :  { %v3126_v48 = vpop.eup %2681 }
 0x62d   :  { %2285 = vmatmul.mubr.f32.gmra.mrb[10].mxu1 %v3126_v48 }
 0x62e   :  { %2638 = vrot.lane.b32.xlu0 %v2637_v51, %s2733_s26 }
 0x62f   :  { %2643 = vrot.lane.b32.xlu1 %v2642_v54, %s2733_s26 }
 0x632   :  { %2648 = vrot.lane.b32.xlu0 %v2647_v55, %s2733_s26 }
 0x633   :  { %2653 = vrot.lane.b32.xlu1 %v2652_v44, %s2733_s26 }
 0x698   :  { %v2619_v63 = vpop.permute.xlu0 %2618 }
 0x699   :  { %v2624_v0 = vpop.permute.xlu1 %2623  ;;  %v2621_v1 = vunpack.i.h.bf16 %v2619_v63  ;;  %v2620_v2 = vunpack.i.l.bf16 %v2619_v63 }
 0x69a   :  { %v2626_v3 = vunpack.i.h.bf16 %v2624_v0  ;;  %v2625_v59 = vunpack.i.l.bf16 %v2624_v0 }
 0x69b   :  { %v2499_v4 = vpack.c.bf16 %v2621_v1, %v2620_v2 }
 0x69c   :  { %v2629_v5 = vpop.permute.xlu0 %2628  ;;  %v2503_v61 = vpack.c.bf16 %v2626_v3, %v2625_v59 }
 0x69d   :  { %v2631_v6 = vunpack.i.h.bf16 %v2629_v5  ;;  %v2630_v9 = vunpack.i.l.bf16 %v2629_v5  ;;  %2500 = vmatprep.subr.bf16.mxu1 %v2499_v4  ;;  %v2634_v10 = vpop.permute.xlu1 %2633 }
 0x69e   :  { %2502 = vmatpush3.bf16.msra.mxu1 %v2499_v4  ;;  %v2636_v11 = vunpack.i.h.bf16 %v2634_v10  ;;  %v2635_v12 = vunpack.i.l.bf16 %v2634_v10  ;;  %v1277_v10 = vld [vmem:[%s3323_s2 + $0x80] sm:$0xff] }
 0x69f   :  { %2504 = vmatprep.subr.bf16.mxu1 %v2503_v61  ;;  %v2507_v62 = vpack.c.bf16 %v2631_v6, %v2630_v9  ;;  %v1276_v9 = vld [vmem:[%s3323_s2 + $0x78] sm:$0xff] }
 0x6a0   :  { %v2639_v15 = vpop.permute.xlu0 %2638  ;;  %v2511_v17 = vpack.c.bf16 %v2636_v11, %v2635_v12  ;;  %v1278_v12 = vld [vmem:[%s3323_s2 + $0x88] sm:$0xff] }
 0x6a1   :  { %v2641_v18 = vunpack.i.h.bf16 %v2639_v15  ;;  %v2640_v19 = vunpack.i.l.bf16 %v2639_v15  ;;  %v2644_v21 = vpop.permute.xlu1 %2643  ;;  %v1385_v15 = vld [vmem:[%s3323_s2 + $0x90] sm:$0xff] }
 0x6a2   :  { %2506 = vmatpush3.bf16.msra.mxu1 %v2503_v61  ;;  %v2646_v22 = vunpack.i.h.bf16 %v2644_v21  ;;  %v2645_v13 = vunpack.i.l.bf16 %v2644_v21 }
 0x6a3   :  { %2508 = vmatprep.subr.bf16.mxu1 %v2507_v62  ;;  %v2515_v24 = vpack.c.bf16 %v2641_v18, %v2640_v19 }
 0x6a4   :  { %v2649_v26 = vpop.permute.xlu0 %2648  ;;  %v2519_v60 = vpack.c.bf16 %v2646_v22, %v2645_v13 }
 0x6a5   :  { %v2651_v27 = vunpack.i.h.bf16 %v2649_v26  ;;  %v2650_v20 = vunpack.i.l.bf16 %v2649_v26  ;;  %v2654_v29 = vpop.permute.xlu1 %2653 }
 0x6a6   :  { %2510 = vmatpush3.bf16.msra.mxu1 %v2507_v62  ;;  %v2656_v30 = vunpack.i.h.bf16 %v2654_v29  ;;  %v2655_v23 = vunpack.i.l.bf16 %v2654_v29  ;;  %v2543_v62 = vpack.c.bf16 %v1278_v12, %v1277_v10  ;;  %v2032_v10 = vld [vmem:[%s3325_s3 + $0xa] ss:$0 sm:$0xff] }
 0x6a7   :  { %2512 = vmatprep.subr.bf16.mxu1 %v2511_v17  ;;  %v2523_v32 = vpack.c.bf16 %v2651_v27, %v2650_v20 }
 0x6a8   :  { %v2527_v33 = vpack.c.bf16 %v2656_v30, %v2655_v23 }
 0x6aa   :  { %2514 = vmatpush3.bf16.msra.mxu1 %v2511_v17  ;;  %v1386_v17 = vld [vmem:[%s3323_s2 + $0x98] sm:$0xff] }
 0x6ab   :  { %2516 = vmatprep.subr.bf16.mxu1 %v2515_v24  ;;  %v2547_v18 = vpack.c.bf16 %v1386_v17, %v1385_v15 }
 0x6ad   :  { %2548 = vmatprep.subr.bf16.mxu0 %v2547_v18 }
 0x6ae   :  { %2518 = vmatpush3.bf16.msra.mxu1 %v2515_v24 }
 0x6af   :  { %2520 = vmatprep.subr.bf16.mxu1 %v2519_v60 }
 0x6b2   :  { %2522 = vmatpush3.bf16.msra.mxu1 %v2519_v60 }
 0x6b3   :  { %2524 = vmatprep.subr.bf16.mxu1 %v2523_v32 }
 0x6b6   :  { %2526 = vmatpush3.bf16.msra.mxu1 %v2523_v32 }
 0x6b7   :  { %2528 = vmatprep.subr.bf16.mxu1 %v2527_v33 }
 0x6ba   :  { %2530 = vmatpush3.bf16.msra.mxu1 %v2527_v33 }
 0x6f9   :  { %v2283_v37 = vpop.f32.mrb[8].mxu1 }
 0x6fa   :  { %2683 = vrcp.f32 %v2283_v37  ;;  %v907_v38 = vpop.f32.mrb[9].mxu1 }
 0x6fb   :  { %2685 = vrcp.f32 %v907_v38 }
 0x700   :  { %v2286_v39 = vpop.f32.mrb[10].mxu1 }
 0x701   :  { %2687 = vrcp.f32 %v2286_v39  ;;  %v917_v41 = vpop.f32.mrb[11].mxu1 }
 0x702   :  { %2689 = vrcp.f32 %v917_v41 }
 0x704   :  { %v2684_v42 = vpop.eup %2683 }
 0x705   :  { %v2686_v43 = vpop.eup %2685  ;;  %v931_v34 = vmul.f32 %v2684_v42, %v3109_v35  ;;  %v2025_v35 = vld [vmem:[%s3325_s3 + $0x7] ss:$0 sm:$0xff] }
 0x706   :  { %v930_v45 = vmul.f32 %v2686_v43, %v3105_v31 }
 0x708   :  { %2319 = vmatprep.mubr.f32.mxu1 %v930_v45 }
 0x709   :  { %2320 = vmatmul.mubr.f32.vlgmr.msra.gmra.mrb[12].mxu1 %v931_v34 }
 0x70b   :  { %v2688_v47 = vpop.eup %2687 }
 0x70c   :  { %v2690_v36 = vpop.eup %2689  ;;  %v933_v50 = vmul.f32 %v2688_v47, %v3126_v48 }
 0x70d   :  { %v932_v49 = vmul.f32 %v2690_v36, %v3117_v40 }
 0x70f   :  { %2322 = vmatprep.mubr.f32.mxu1 %v932_v49 }
 0x710   :  { %2323 = vmatmul.mubr.f32.gmra.mrb[14].mxu1 %v933_v50 }
 0x7dc   :  { %v2321_v51 = vpop.f32.mrb[12].mxu1 }
 0x7dd   :  { %v1064_v52 = vpop.f32.mrb[13].mxu1 }
 0x7de   :  { %2333 = vmatprep.mubr.msk.f32.mxu0 %vm35_vm0, %v1064_v52 }
 0x7df   :  { %2334 = vmatmul.mubr.msk.f32.vlgmr.msra.gmra.mrb[8].mxu0 %vm35_vm0, %v2321_v51 }
 0x7e0   :  { %2550 = vmatpush3.bf16.msra.mxu0 %v2547_v18 }
 0x7e3   :  { %v2324_v53 = vpop.f32.mrb[14].mxu1 }
 0x7e4   :  { %v1074_v31 = vpop.f32.mrb[15].mxu1 }
 0x7e5   :  { %2336 = vmatprep.mubr.msk.f32.mxu0 %vm35_vm0, %v1074_v31 }
 0x7e6   :  { %2337 = vmatmul.mubr.msk.f32.gmra.mrb[10].mxu0 %vm35_vm0, %v2324_v53 }
 0x8b2   :  { %v2335_v40 = vpop.f32.mrb[8].mxu0 }
 0x8b3   :  { %v1176_v48 = vadd.f32 %v2335_v40, %v2025_v35  ;;  %v1170_v54 = vpop.f32.mrb[9].mxu0 }
 0x8b4   :  { %v1171_v55 = vadd.f32 %v2025_v35, %v1170_v54 }
 0x8b5   :  { %v3161_v44 = vadd.f32 %v1176_v48, %v2932_v58 }
 0x8b6   :  { %v3164_v14 = vadd.f32 %v1171_v55, %v2930_v56 }
 0x8b7   :  { %v1198_v16 = vsel %vm35_vm0, %v3161_v44, 0.0  ;;  %v1212_v28 = vmul.f32 %v3161_v44, %v3161_v44 }
 0x8b8   :  { %1199 = vadd.xlane.f32.xlu1 %v1198_v16  ;;  %v1195_v25 = vsel %vm35_vm0, %v3164_v14, 0.0  ;;  %v1211_v1 = vmul.f32 %v3164_v14, %v3164_v14 }
 0x8b9   :  { %1196 = vadd.xlane.f32.xlu0 %v1195_v25  ;;  %v2338_v57 = vpop.f32.mrb[10].mxu0  ;;  %v1218_v56 = vsel %vm35_vm0, %v1212_v28, 0.0  ;;  %v2030_v25 = vld [vmem:[%s3325_s3 + $0x8] ss:$0 sm:$0xff] }
 0x8ba   :  { %v1186_v46 = vadd.f32 %v2338_v57, %v2025_v35  ;;  %v1180_v63 = vpop.f32.mrb[11].mxu0 }
 0x8bb   :  { %v1181_v0 = vadd.f32 %v2025_v35, %v1180_v63 }
 0x8bc   :  { %v3173_v58 = vadd.f32 %v1186_v46, %v2946_v8  ;;  %v1215_v8 = vsel %vm35_vm0, %v1211_v1, 0.0 }
 0x8bd   :  { %1219 = vadd.xlane.f32.xlu0 %v1218_v56  ;;  %v3183_v59 = vadd.f32 %v1181_v0, %v2944_v7  ;;  %v1275_v7 = vld [vmem:[%s3323_s2 + $0x70] sm:$0xff]  ;;  %v2031_v0 = vld [vmem:[%s3325_s3 + $0x9] ss:$0 sm:$0xff] }
 0x8be   :  { %v1204_v2 = vsel %vm35_vm0, %v3173_v58, 0.0  ;;  %v1214_v3 = vmul.f32 %v3173_v58, %v3173_v58  ;;  %v2539_v11 = vpack.c.bf16 %v1276_v9, %v1275_v7 }
 0x8bf   :  { %1205 = vadd.xlane.f32.xlu1 %v1204_v2  ;;  %v1201_v5 = vsel %vm35_vm0, %v3183_v59, 0.0  ;;  %v1213_v61 = vmul.f32 %v3183_v59, %v3183_v59 }
 0x8c0   :  { %v1224_v4 = vsel %vm35_vm0, %v1214_v3, 0.0  ;;  %2540 = vmatprep.subr.bf16.mxu1 %v2539_v11 }
 0x8c1   :  { %1216 = vadd.xlane.f32.xlu0 %v1215_v8  ;;  %v1221_v6 = vsel %vm35_vm0, %v1213_v61, 0.0  ;;  %2542 = vmatpush3.bf16.msra.mxu1 %v2539_v11 }
 0x8c2   :  { %2544 = vmatprep.subr.bf16.mxu1 %v2543_v62 }
 0x8c3   :  { %1225 = vadd.xlane.f32.xlu1 %v1224_v4 }
 0x8c5   :  { %1202 = vadd.xlane.f32.xlu0 %v1201_v5  ;;  %2546 = vmatpush3.bf16.msra.mxu1 %v2543_v62 }
 0x8c9   :  { %1222 = vadd.xlane.f32.xlu0 %v1221_v6 }
 0x945   :  { %v1200_v19 = vpop.xlane.xlu1 %1199 }
 0x946   :  { %v1197_v21 = vpop.xlane.xlu0 %1196  ;;  %v1208_v22 = vmul.f32 0.03125, %v1200_v19 }
 0x947   :  { %v1207_v26 = vmul.f32 0.03125, %v1197_v21 }
 0x948   :  { %v1232_v24 = vmul.f32 %v1208_v22, %v1208_v22  ;;  %v1244_v48 = vsub.f32 %v3161_v44, %v1208_v22 }
 0x949   :  { %v1231_v23 = vmul.f32 %v1207_v26, %v1207_v26  ;;  %v1243_v16 = vsub.f32 %v3164_v14, %v1207_v26 }
 0x94a   :  { %v1220_v13 = vpop.xlane.xlu0 %1219 }
 0x94b   :  { %v1228_v60 = vmul.f32 0.03125, %v1220_v13 }
 0x94c   :  { %v1206_v27 = vpop.xlane.xlu1 %1205 }
 0x94d   :  { %v1236_v20 = vsub.f32 %v1228_v60, %v1232_v24  ;;  %v1210_v29 = vmul.f32 0.03125, %v1206_v27  ;;  %v2037_v60 = vld [vmem:[%s3325_s3 + $0xb] ss:$0 sm:$0xff] }
 0x94e   :  { %v1217_v30 = vpop.xlane.xlu0 %1216 }
 0x94f   :  { %v1240_v32 = vmax.f32 %v1236_v20, 0.0  ;;  %v1227_v33 = vmul.f32 0.03125, %v1217_v30  ;;  %v1234_v39 = vmul.f32 %v1210_v29, %v1210_v29  ;;  %v1246_v44 = vsub.f32 %v3173_v58, %v1210_v29  ;;  %v1387_v58 = vld [vmem:[%s3323_s2 + $0xa0] sm:$0xff] }
 0x950   :  { %v1226_v37 = vpop.xlane.xlu1 %1225 }
 0x951   :  { %v1248_v38 = vadd.f32 1e-05, %v1240_v32  ;;  %v1235_v41 = vsub.f32 %v1227_v33, %v1231_v23  ;;  %v1230_v42 = vmul.f32 0.03125, %v1226_v37 }
 0x952   :  { %v1203_v43 = vpop.xlane.xlu0 %1202 }
 0x953   :  { %2691 = vrsqrt.f32 %v1248_v38  ;;  %v1239_v45 = vmax.f32 %v1235_v41, 0.0  ;;  %v1238_v34 = vsub.f32 %v1230_v42, %v1234_v39  ;;  %v1209_v47 = vmul.f32 0.03125, %v1203_v43 }
 0x955   :  { %v1247_v36 = vadd.f32 1e-05, %v1239_v45  ;;  %v1242_v49 = vmax.f32 %v1238_v34, 0.0  ;;  %v1233_v52 = vmul.f32 %v1209_v47, %v1209_v47  ;;  %v1245_v14 = vsub.f32 %v3183_v59, %v1209_v47  ;;  %v1388_v59 = vld [vmem:[%s3323_s2 + $0xa8] sm:$0xf] }
 0x956   :  { %v1223_v50 = vpop.xlane.xlu0 %1222  ;;  %v2551_v9 = vpack.c.bf16 %v1388_v59, %v1387_v58 }
 0x957   :  { %2693 = vrsqrt.f32 %v1247_v36  ;;  %v1250_v51 = vadd.f32 1e-05, %v1242_v49  ;;  %v1229_v53 = vmul.f32 0.03125, %v1223_v50 }
 0x958   :  { %2553 = vmatprep.subr.msk.bf16.mxu0 %vm2552_vm13, %v2551_v9 }
 0x959   :  { %v1237_v31 = vsub.f32 %v1229_v53, %v1233_v52  ;;  %2695 = vrsqrt.f32 %v1250_v51  ;;  %2556 = vmatpush3.bf16.msk.msra.mxu0 %vm2552_vm13, %v2551_v9 }
 0x95b   :  { %v1241_v35 = vmax.f32 %v1237_v31, 0.0 }
 0x95d   :  { %v2692_v40 = vpop.eup %2691  ;;  %v1249_v54 = vadd.f32 1e-05, %v1241_v35 }
 0x95e   :  { %v1256_v55 = vmul.f32 %v2692_v40, %v1244_v48  ;;  %v2735_v40 = vmov 0.0|0.0   ;;  %v2737_v48 = vmov 0.0  }
 0x95f   :  { %2697 = vrsqrt.f32 %v1249_v54  ;;  %2557 = vmatprep.subr.bf16.mxu1 %v2735_v40  ;;  %2563 = vmatprep.subr.bf16.mxu0 %v2735_v40  ;;  %1968 = vst [vmem:[%s3327_s4] sm:$0xff] %v2737_v48 }
 0x960   :  { %v1264_v46 = vmul.f32 %v2030_v25, %v1256_v55 }
 0x961   :  { %v2694_v28 = vpop.eup %2693 }
 0x962   :  { %v1255_v57 = vmul.f32 %v2694_v28, %v1243_v16  ;;  %v1272_v2 = vadd.f32 %v2031_v0, %v1264_v46 }
 0x963   :  { %v2696_v63 = vpop.eup %2695 }
 0x964   :  { %v1263_v56 = vmul.f32 %v2030_v25, %v1255_v57  ;;  %v1258_v3 = vmul.f32 %v2696_v63, %v1246_v44 }
 0x966   :  { %v1271_v1 = vadd.f32 %v2031_v0, %v1263_v56  ;;  %v1266_v5 = vmul.f32 %v2030_v25, %v1258_v3 }
 0x968   :  { %2347 = vmatprep.mubr.msk.f32.mxu1 %vm35_vm0, %v1271_v1  ;;  %v1274_v7 = vadd.f32 %v2031_v0, %v1266_v5 }
 0x969   :  { %v2698_v8 = vpop.eup %2697  ;;  %2348 = vmatmul.mubr.msk.f32.vlgmr.msra.gmra.mrb[16].mxu1 %vm35_vm0, %v1272_v2 }
 0x96a   :  { %v1257_v4 = vmul.f32 %v2698_v8, %v1245_v14 }
 0x96c   :  { %v1265_v61 = vmul.f32 %v2030_v25, %v1257_v4 }
 0x96e   :  { %v1273_v6 = vadd.f32 %v2031_v0, %v1265_v61 }
 0x970   :  { %2350 = vmatprep.mubr.msk.f32.mxu1 %vm35_vm0, %v1273_v6 }
 0x971   :  { %2351 = vmatmul.mubr.msk.f32.gmra.mrb[18].mxu1 %vm35_vm0, %v1274_v7 }
 0x972   :  { %2375 = vmatprep.mubr.msk.f32.mxu1 %vm2736_vm15, %v2737_v48 }
 0xa3c   :  { %v2349_v11 = vpop.f32.mrb[16].mxu1 }
 0xa3d   :  { %v1368_v12 = vadd.f32 %v2349_v11, %v2032_v10  ;;  %v1362_v62 = vpop.f32.mrb[17].mxu1 }
 0xa3e   :  { %v1363_v15 = vadd.f32 %v2032_v10, %v1362_v62 }
 0xa3f   :  { %v1382_v18 = vmax.f32 %v1368_v12, 0.0 }
 0xa40   :  { %v1381_v17 = vmax.f32 %v1363_v15, 0.0 }
 0xa42   :  { %2361 = vmatprep.mubr.msk.f32.mxu0 %vm1394_vm14, %v1381_v17 }
 0xa43   :  { %2362 = vmatmul.mubr.msk.f32.vlgmr.msra.gmra.mrb[12].mxu0 %vm1394_vm14, %v1382_v18 }
 0xa44   :  { %v2352_v19 = vpop.f32.mrb[18].mxu1 }
 0xa45   :  { %v1378_v21 = vadd.f32 %v2352_v19, %v2032_v10  ;;  %v1372_v22 = vpop.f32.mrb[19].mxu1 }
 0xa46   :  { %v1373_v13 = vadd.f32 %v2032_v10, %v1372_v22 }
 0xa47   :  { %v1384_v26 = vmax.f32 %v1378_v21, 0.0 }
 0xa48   :  { %v1383_v24 = vmax.f32 %v1373_v13, 0.0 }
 0xa4a   :  { %2364 = vmatprep.mubr.msk.f32.mxu0 %vm1394_vm14, %v1383_v24  ;;  %v2043_v24 = vld [vmem:[%s3325_s3 + $0xc] ss:$0 sm:$0xff] }
 0xa4b   :  { %2365 = vmatmul.mubr.msk.f32.gmra.mrb[14].mxu0 %vm1394_vm14, %v1384_v26 }
 0xa4c   :  { %2386 = vmatprep.mubr.msk.f32.mxu0 %vm2736_vm15, %v2737_v48 }
 0xb16   :  { %v2363_v27 = vpop.f32.mrb[12].mxu0 }
 0xb17   :  { %v1483_v20 = vadd.f32 %v2363_v27, %v2037_v60  ;;  %v1477_v29 = vpop.f32.mrb[13].mxu0  ;;  %v2044_v27 = vld [vmem:[%s3325_s3 + $0xd] ss:$0 sm:$0xff] }
 0xb18   :  { %v1478_v30 = vadd.f32 %v2037_v60, %v1477_v29 }
 0xb19   :  { %v3237_v23 = vadd.f32 %v1483_v20, %v1272_v2 }
 0xb1a   :  { %v3239_v32 = vadd.f32 %v1478_v30, %v1271_v1 }
 0xb1b   :  { %v1505_v33 = vsel %vm35_vm0, %v3237_v23, 0.0  ;;  %v1519_v37 = vmul.f32 %v3237_v23, %v3237_v23 }
 0xb1c   :  { %1506 = vadd.xlane.f32.xlu1 %v1505_v33  ;;  %v1502_v38 = vsel %vm35_vm0, %v3239_v32, 0.0  ;;  %v1518_v39 = vmul.f32 %v3239_v32, %v3239_v32 }
 0xb1d   :  { %1503 = vadd.xlane.f32.xlu0 %v1502_v38  ;;  %v1525_v45 = vsel %vm35_vm0, %v1519_v37, 0.0 }
 0xb1e   :  { %v2366_v41 = vpop.f32.mrb[14].mxu0  ;;  %v1522_v47 = vsel %vm35_vm0, %v1518_v39, 0.0 }
 0xb1f   :  { %v1493_v42 = vadd.f32 %v2366_v41, %v2037_v60  ;;  %v1487_v43 = vpop.f32.mrb[15].mxu0 }
 0xb20   :  { %v1488_v34 = vadd.f32 %v2037_v60, %v1487_v43  ;;  %1526 = vadd.xlane.f32.xlu1 %v1525_v45 }
 0xb21   :  { %v3251_v36 = vadd.f32 %v1493_v42, %v1274_v7  ;;  %1523 = vadd.xlane.f32.xlu0 %v1522_v47 }
 0xb22   :  { %v3253_v49 = vadd.f32 %v1488_v34, %v1273_v6 }
 0xb23   :  { %v1511_v50 = vsel %vm35_vm0, %v3251_v36, 0.0  ;;  %v1521_v51 = vmul.f32 %v3251_v36, %v3251_v36 }
 0xb24   :  { %1512 = vadd.xlane.f32.xlu1 %v1511_v50  ;;  %v1508_v52 = vsel %vm35_vm0, %v3253_v49, 0.0  ;;  %v1520_v53 = vmul.f32 %v3253_v49, %v3253_v49 }
 0xb25   :  { %1509 = vadd.xlane.f32.xlu0 %v1508_v52  ;;  %v1531_v31 = vsel %vm35_vm0, %v1521_v51, 0.0 }
 0xb26   :  { %v1528_v35 = vsel %vm35_vm0, %v1520_v53, 0.0 }
 0xb28   :  { %1532 = vadd.xlane.f32.xlu1 %v1531_v31 }
 0xb29   :  { %1529 = vadd.xlane.f32.xlu0 %v1528_v35 }
 0xba9   :  { %v1507_v54 = vpop.xlane.xlu1 %1506 }
 0xbaa   :  { %v1515_v55 = vmul.f32 0.03125, %v1507_v54  ;;  %v1504_v16 = vpop.xlane.xlu0 %1503 }
 0xbab   :  { %v1514_v25 = vmul.f32 0.03125, %v1504_v16 }
 0xbac   :  { %v1539_v57 = vmul.f32 %v1515_v55, %v1515_v55  ;;  %v1551_v21 = vsub.f32 %v3237_v23, %v1515_v55 }
 0xbad   :  { %v1527_v28 = vpop.xlane.xlu1 %1526  ;;  %v1538_v0 = vmul.f32 %v1514_v25, %v1514_v25  ;;  %v1550_v13 = vsub.f32 %v3239_v32, %v1514_v25 }
 0xbae   :  { %v1535_v46 = vmul.f32 0.03125, %v1527_v28  ;;  %v1524_v63 = vpop.xlane.xlu0 %1523 }
 0xbaf   :  { %v1534_v56 = vmul.f32 0.03125, %v1524_v63 }
 0xbb0   :  { %v1543_v44 = vsub.f32 %v1535_v46, %v1539_v57  ;;  %v1582_v57 = vld [vmem:[%s3325_s3 + $0x18] sm:$0xf] }
 0xbb1   :  { %v1542_v1 = vsub.f32 %v1534_v56, %v1538_v0  ;;  %v1513_v2 = vpop.xlane.xlu1 %1512 }
 0xbb2   :  { %v1547_v3 = vmax.f32 %v1543_v44, 0.0  ;;  %v1517_v14 = vmul.f32 0.03125, %v1513_v2  ;;  %v1510_v8 = vpop.xlane.xlu0 %1509 }
 0xbb3   :  { %v1546_v4 = vmax.f32 %v1542_v1, 0.0  ;;  %v1516_v5 = vmul.f32 0.03125, %v1510_v8 }
 0xbb4   :  { %v1555_v61 = vadd.f32 1e-05, %v1547_v3  ;;  %v1541_v58 = vmul.f32 %v1517_v14, %v1517_v14  ;;  %v1553_v23 = vsub.f32 %v3251_v36, %v1517_v14 }
 0xbb5   :  { %v1554_v6 = vadd.f32 1e-05, %v1546_v4  ;;  %v1533_v7 = vpop.xlane.xlu1 %1532  ;;  %v1540_v10 = vmul.f32 %v1516_v5, %v1516_v5  ;;  %v1552_v32 = vsub.f32 %v3253_v49, %v1516_v5  ;;  %v25_v49 = vld [vmem:[%s3324_s0 + $0x40] sm:$0xf] }
 0xbb6   :  { %2699 = vrsqrt.f32 %v1555_v61  ;;  %v1537_v59 = vmul.f32 0.03125, %v1533_v7  ;;  %v1530_v9 = vpop.xlane.xlu0 %1529 }
 0xbb7   :  { %2701 = vrsqrt.f32 %v1554_v6  ;;  %v1536_v11 = vmul.f32 0.03125, %v1530_v9 }
 0xbb8   :  { %v1545_v12 = vsub.f32 %v1537_v59, %v1541_v58 }
 0xbb9   :  { %v1544_v62 = vsub.f32 %v1536_v11, %v1540_v10 }
 0xbba   :  { %v1549_v15 = vmax.f32 %v1545_v12, 0.0 }
 0xbbb   :  { %v1548_v17 = vmax.f32 %v1544_v62, 0.0 }
 0xbbc   :  { %v1557_v18 = vadd.f32 1e-05, %v1549_v15 }
 0xbbd   :  { %v1556_v19 = vadd.f32 1e-05, %v1548_v17 }
 0xbbe   :  { %2703 = vrsqrt.f32 %v1557_v18 }
 0xbbf   :  { %2705 = vrsqrt.f32 %v1556_v19 }
 0xbc0   :  { %v2700_v22 = vpop.eup %2699 }
 0xbc1   :  { %v2702_v26 = vpop.eup %2701  ;;  %v1563_v60 = vmul.f32 %v2700_v22, %v1551_v21 }
 0xbc2   :  { %v1562_v20 = vmul.f32 %v2702_v26, %v1550_v13  ;;  %v1851_v13 = vld [vmem:[%s3325_s3 + $0x16] sm:$0x3] }
 0xbc3   :  { %v1571_v29 = vmul.f32 %v2043_v24, %v1563_v60 }
 0xbc4   :  { %v1570_v30 = vmul.f32 %v2043_v24, %v1562_v20 }
 0xbc5   :  { %v1579_v33 = vadd.f32 %v2044_v27, %v1571_v29 }
 0xbc6   :  { %v1578_v37 = vadd.f32 %v2044_v27, %v1570_v30 }
 0xbc7   :  { %v1658_v38 = vmul.f32 1.442695, %v1579_v33 }
 0xbc8   :  { %v2704_v39 = vpop.eup %2703  ;;  %v2558_v41 = vpack.c.bf16 %v1579_v33, %v1578_v37  ;;  %v1656_v42 = vmul.f32 1.442695, %v1578_v37 }
 0xbc9   :  { %v2706_v43 = vpop.eup %2705  ;;  %2707 = vpow2.f32 %v1658_v38  ;;  %v1565_v45 = vmul.f32 %v2704_v39, %v1553_v23 }
 0xbca   :  { %2559 = vmatpush3.bf16.msra.mxu1 %v2558_v41  ;;  %2709 = vpow2.f32 %v1656_v42  ;;  %v1564_v34 = vmul.f32 %v2706_v43, %v1552_v32  ;;  %v2738_v32 = vmov 0  }
 0xbcb   :  { %2560 = vmatprep.subr.bf16.mxu1 %v2735_v40  ;;  %v1573_v47 = vmul.f32 %v2043_v24, %v1565_v45  ;;  %2657 = vset.pattern.permute.xlu1 %v2738_v32 }
 0xbcc   :  { %v1572_v50 = vmul.f32 %v2043_v24, %v1564_v34  ;;  %2658 = vset.pattern.permute.xlu0 %v2738_v32 }
 0xbcd   :  { %v1581_v51 = vadd.f32 %v2044_v27, %v1573_v47 }
 0xbce   :  { %v1580_v52 = vadd.f32 %v2044_v27, %v1572_v50 }
 0xbcf   :  { %v1662_v53 = vmul.f32 1.442695, %v1581_v51 }
 0xbd0   :  { %v2561_v36 = vpack.c.bf16 %v1581_v51, %v1580_v52  ;;  %v1660_v31 = vmul.f32 1.442695, %v1580_v52 }
 0xbd1   :  { %2711 = vpow2.f32 %v1662_v53 }
 0xbd2   :  { %2562 = vmatpush3.bf16.msra.mxu1 %v2561_v36  ;;  %2713 = vpow2.f32 %v1660_v31 }
 0xbd3   :  { %v2708_v35 = vpop.eup %2707  ;;  %2389 = vmatprep.subr.mxu1 %v2737_v48 }
 0xbd4   :  { %v2710_v54 = vpop.eup %2709 }
 0xbd5   :  { %2376 = vmatmul.mubr.msk.f32.vlgmr.msra.gmra.mrb[20].mxu1 %vm35_vm0, %v25_v49  ;;  %v2564_v55 = vpack.c.bf16 %v2708_v35, %v2710_v54 }
 0xbd6   :  { %2391 = vmatprep.mubr.msk.f32.mxu1 %vm2736_vm15, %v2737_v48 }
 0xbd7   :  { %2565 = vmatpush3.bf16.msra.mxu0 %v2564_v55  ;;  %v2051_v55 = vld [vmem:[%s3325_s3 + $0xe] ss:$0 sm:$0xff] }
 0xbd8   :  { %2566 = vmatprep.subr.bf16.mxu0 %v2735_v40 }
 0xbdb   :  { %v2712_v16 = vpop.eup %2711 }
 0xbdc   :  { %v2714_v25 = vpop.eup %2713 }
 0xbdd   :  { %v2567_v28 = vpack.c.bf16 %v2712_v16, %v2714_v25 }
 0xbdf   :  { %2568 = vmatpush3.bf16.msra.mxu0 %v2567_v28  ;;  %v2052_v28 = vld [vmem:[%s3325_s3 + $0xf] ss:$0 sm:$0xff] }
 0xbe0   :  { %2394 = vmatprep.subr.mxu0 %v2737_v48 }
 0xbe2   :  { %2387 = vmatmul.mubr.msk.f32.vlgmr.msra.gmra.mrb[16].mxu0 %vm35_vm0, %v1582_v57 }
 0xbe3   :  { %2396 = vmatprep.mubr.msk.f32.mxu0 %vm2736_vm15, %v2737_v48  ;;  %v1773_v48 = vld [vmem:[%s3325_s3 + $0x14] sm:$0x3] }
 0xca8   :  { %v1652_v46 = vpop.f32.mrb[20].mxu1 }
 0xca9   :  { %v1739_v63 = vmul.f32 %v1652_v46, %v1652_v46  ;;  %v2377_v0 = vpop.f32.mrb[21].mxu1 }
 0xcab   :  { %v1741_v40 = vsel %vm1740_vm1, %v1739_v63, 0.0 }
 0xcac   :  { %1742 = vadd.xlane.f32.xlu1 %v1741_v40 }
 0xcb5   :  { %v1733_v56 = vpop.f32.mrb[16].mxu0 }
 0xcb6   :  { %2715 = vlog2.f32 %v1733_v56  ;;  %v2388_v44 = vpop.f32.mrb[17].mxu0 }
 0xcc0   :  { %v2716_v1 = vpop.eup %2715 }
 0xcc1   :  { %v1738_v2 = vmul.f32 0.6931472, %v2716_v1 }
 0xcc3   :  { %v1754_v3 = vmul.f32 %v1738_v2, %v1738_v2 }
 0xcc5   :  { %v1755_v14 = vsel %vm1740_vm1, %v1754_v3, 0.0 }
 0xcc6   :  { %1756 = vadd.xlane.f32.xlu0 %v1755_v14 }
 0xd39   :  { %v1743_v10 = vpop.xlane.xlu1 %1742 }
 0xd3a   :  { %vm1746_vm4 = vcmp.eq.f32.partialorder %v1743_v10, inf  ;;  %v1749_v62 = vand.u32 2147483648, %v1743_v10  ;;  %vm1748_vm5 = vcmp.eq.f32.partialorder %v1743_v10, 0.0 }
 0xd53   :  { %v1757_v8 = vpop.xlane.xlu0 %1756 }
 0xd54   :  { %2717 = vrsqrt.f32 %v1757_v8  ;;  %vm1760_vm2 = vcmp.eq.f32.partialorder %v1757_v8, inf  ;;  %v1763_v61 = vand.u32 2147483648, %v1757_v8  ;;  %vm1762_vm3 = vcmp.eq.f32.partialorder %v1757_v8, 0.0 }
 0xd5e   :  { %v2718_v4 = vpop.eup %2717 }
 0xd5f   :  { %v1759_v5 = vmul.f32 %v2718_v4, %v1757_v8 }
 0xd61   :  { %v1761_v6 = vsel %vm1760_vm2, %v1757_v8, %v1759_v5 }
 0xd62   :  { %v1764_v7 = vsel %vm1762_vm3, %v1763_v61, %v1761_v6 }
 0xd63   :  { %v1765_v58 = vmax.f32 %v1764_v7, 1e-12 }
 0xd65   :  { %2719 = vrcp.f32 %v1765_v58 }
 0xd66   :  { %2721 = vrsqrt.f32 %v1743_v10 }
 0xd6f   :  { %v2720_v59 = vpop.eup %2719 }
 0xd70   :  { %v1767_v9 = vmul.f32 %v2720_v59, %v1738_v2  ;;  %v2722_v11 = vpop.eup %2721 }
 0xd71   :  { %v1745_v12 = vmul.f32 %v2722_v11, %v1743_v10 }
 0xd72   :  { %1769 = vrot.lane.b32.xlu0 %v1767_v9, %s2731_s27 }
 0xd73   :  { %v1747_v15 = vsel %vm1746_vm4, %v1743_v10, %v1745_v12 }
 0xd74   :  { %v1750_v17 = vsel %vm1748_vm5, %v1749_v62, %v1747_v15 }
 0xd75   :  { %v1751_v18 = vmax.f32 %v1750_v17, 1e-12 }
 0xd77   :  { %2723 = vrcp.f32 %v1751_v18 }
 0xd81   :  { %v2724_v19 = vpop.eup %2723 }
 0xd82   :  { %v1753_v21 = vmul.f32 %v2724_v19, %v1652_v46 }
 0xde4   :  { %v1770_v22 = vpop.permute.xlu0 %1769 }
 0xde5   :  { %v1772_v24 = vsel %vm35_vm0, %v1753_v21, %v1770_v22 }
 0xde6   :  { %v1970_v26 = vsel %vm1969_vm6, %v1772_v24, 0.0  ;;  %2390 = vmatpush3.msk.msra.mxu1 %vm1407_vm11, %v1772_v24  ;;  %2395 = vmatpush3.msk.msra.mxu0 %vm1407_vm11, %v1772_v24 }
 0xde7   :  { %2392 = vmatmul.mubr.msk.f32.vlgmr.msra.gmra.mrb[22].mxu1 %vm1774_vm7, %v1773_v48  ;;  %2397 = vmatmul.mubr.msk.f32.vlgmr.msra.gmra.mrb[18].mxu0 %vm1774_vm7, %v1851_v13  ;;  %1971 = vst [vmem:[%s3327_s4] sm:$0xf] %v1970_v26 }
 0xeba   :  { %v1847_v60 = vpop.f32.mrb[22].mxu1  ;;  %v1921_v27 = vpop.f32.mrb[18].mxu0 }
 0xebb   :  { %v1930_v20 = vmul.f32 %v1847_v60, %v1847_v60  ;;  %v2393_v29 = vpop.f32.mrb[23].mxu1  ;;  %v1925_v30 = vmul.f32 %v1921_v27, %v1847_v60  ;;  %v1941_v33 = vmul.f32 %v1921_v27, %v1921_v27  ;;  %v2398_v37 = vpop.f32.mrb[19].mxu0 }
 0xebd   :  { %v1931_v23 = vsel %vm1926_vm8, %v1930_v20, 0.0  ;;  %v1942_v38 = vsel %vm1926_vm8, %v1941_v33, 0.0  ;;  %v1927_v39 = vsel %vm1926_vm8, %v1925_v30, 0.0 }
 0xebe   :  { %1932 = vadd.xlane.f32.xlu1 %v1931_v23 }
 0xec2   :  { %1943 = vadd.xlane.f32.xlu1 %v1942_v38 }
 0xec6   :  { %1928 = vadd.xlane.f32.xlu1 %v1927_v39 }
 0xf4b   :  { %v1933_v41 = vpop.xlane.xlu1 %1932 }
 0xf4c   :  { %2725 = vrsqrt.f32 %v1933_v41  ;;  %vm1936_vm0 = vcmp.eq.f32.partialorder %v1933_v41, inf  ;;  %v1939_v51 = vand.u32 2147483648, %v1933_v41  ;;  %vm1938_vm10 = vcmp.eq.f32.partialorder %v1933_v41, 0.0 }
 0xf4f   :  { %v1944_v42 = vpop.xlane.xlu1 %1943 }
 0xf50   :  { %2727 = vrsqrt.f32 %v1944_v42  ;;  %vm1947_vm9 = vcmp.eq.f32.partialorder %v1944_v42, inf  ;;  %v1950_v52 = vand.u32 2147483648, %v1944_v42  ;;  %vm1949_vm11 = vcmp.eq.f32.partialorder %v1944_v42, 0.0 }
 0xf53   :  { %v1929_v16 = vpop.xlane.xlu1 %1928 }
 0xf56   :  { %v2726_v43 = vpop.eup %2725 }
 0xf57   :  { %v1935_v45 = vmul.f32 %v2726_v43, %v1933_v41 }
 0xf59   :  { %v1937_v47 = vsel %vm1936_vm0, %v1933_v41, %v1935_v45 }
 0xf5a   :  { %v2728_v34 = vpop.eup %2727  ;;  %v1940_v36 = vsel %vm1938_vm10, %v1939_v51, %v1937_v47 }
 0xf5b   :  { %v1946_v50 = vmul.f32 %v2728_v34, %v1944_v42 }
 0xf5d   :  { %v1948_v53 = vsel %vm1947_vm9, %v1944_v42, %v1946_v50 }
 0xf5e   :  { %v1951_v31 = vsel %vm1949_vm11, %v1950_v52, %v1948_v53 }
 0xf5f   :  { %v1952_v49 = vmul.f32 %v1951_v31, %v1940_v36 }
 0xf61   :  { %v1953_v35 = vmax.f32 %v1952_v49, 1e-08 }
 0xf63   :  { %2729 = vrcp.f32 %v1953_v35 }
 0xf6d   :  { %v2730_v54 = vpop.eup %2729 }
 0xf6e   :  { %v1955_v25 = vmul.f32 %v2730_v54, %v1929_v16 }
 0xf70   :  { %v1961_v57 = vmul.f32 %v2051_v55, %v1955_v25 }
 0xf72   :  { %v1967_v46 = vadd.f32 %v2052_v28, %v1961_v57 }
 0xf74   :  { %1974 = vperm.xlu1 %2657, %v1967_v46  }
 0xff3   :  { %v1975_v63 = vpop.permute.xlu1 %1974 }
 0xff4   :  { %1977 = vst [vmem:[%s3327_s4 + $0x4] sm:$0x3] %v1975_v63 }

</bundles_post_ra>
